<compile_context>
chip_gen: v7x
topology: tpu7x:2x2x1
jax: 0.10.0
libtpu: 0.0.40
codegen_flags: <defaults>
</compile_context>

<pallas_src>
import math
import functools

import jax
import jax.numpy as jnp
from jax.experimental import pallas as pl
from jax.experimental.pallas import tpu as pltpu


# ---------------------------------------------------------------------------
# Fused forward-pass kernel (one grid step = one batch tile of TM rows)
# ---------------------------------------------------------------------------

def _mlp_fused_kernel(x_ref, t_ref, freqs_ref,
                      w_cat_ref, biases_ref,
                      w_blk_ref, w_out_ref, b_out_ref,
                      o_ref, *, layers):
    """Fully fused MLP forward for one (TM, Dd) batch tile.

    x_ref      : (TM, Dd)           input samples
    t_ref      : (TM, 1)            raw diffusion time t
    freqs_ref  : (1, hd)            max_positions * exp(-arange(hd) * emb_scale)
    w_cat_ref  : (Dd+2*hd, C) bf16  [W_in^T ; W_t^T[:hd] ; W_t^T[hd:2hd]]
    biases_ref : (L+1, 1, C)  f32   [b_in + b_t, block biases...]
    w_blk_ref  : (L, C, C)    bf16  block ff weights (pre-transposed)
    w_out_ref  : (C, Dd)      bf16  out_projection.weight^T
    b_out_ref  : (1, Dd)      f32   out_projection.bias
    o_ref      : (TM, Dd)           output tile
    """
    mxu_dtype = w_cat_ref.dtype

    # Sinusoidal t-embedding kept in registers (EUP); f32 elementwise.
    prod = t_ref[...] * freqs_ref[...]                          # (TM, hd)
    xin = jnp.concatenate(
        [x_ref[...], jnp.sin(prod), jnp.cos(prod)], axis=1)     # (TM, Dd+2*hd)

    # Fused in_projection + t_projection (single MXU pass, f32 accumulation).
    h = jnp.dot(xin.astype(mxu_dtype), w_cat_ref[...],
                preferred_element_type=jnp.float32)
    h = h + biases_ref[0]                                        # b_in + b_t

    # ReLU blocks, statically unrolled; weights bf16, accum + elementwise f32.
    for i in range(layers):
        h = jnp.dot(h.astype(mxu_dtype), w_blk_ref[i],
                    preferred_element_type=jnp.float32)
        h = jnp.maximum(h + biases_ref[i + 1], 0.0)

    # out_projection.
    out = jnp.dot(h.astype(mxu_dtype), w_out_ref[...],
                  preferred_element_type=jnp.float32)
    o_ref[...] = (out + b_out_ref[...]).astype(o_ref.dtype)


# ---------------------------------------------------------------------------
# Parameter init (PyTorch nn.Linear-style uniform fan-in init) + host prep
# ---------------------------------------------------------------------------

def init_linear(key, out_features, in_features):
    kw, kb = jax.random.split(key)
    bound = 1.0 / math.sqrt(in_features)
    w = jax.random.uniform(kw, (out_features, in_features),
                           minval=-bound, maxval=bound, dtype=jnp.float32)
    b = jax.random.uniform(kb, (1, out_features),
                           minval=-bound, maxval=bound, dtype=jnp.float32)
    return w, b


def init_mlp_params(key, channels_data, layers, channels, channels_t):
    keys = jax.random.split(key, 3 + layers)
    return {
        "in_projection": init_linear(keys[0], channels, channels_data),
        "t_projection": init_linear(keys[1], channels, channels_t),
        "blocks": [init_linear(keys[2 + i], channels, channels)
                   for i in range(layers)],
        "out_projection": init_linear(keys[2 + layers], channels_data, channels),
    }


def prepare_fused_params(params, channels_t, *, max_positions=10000,
                         mxu_dtype=jnp.bfloat16):
    """One-time host-side prep: transpose + concatenate + stack weights, fold
    biases, precompute scaled sinusoid frequencies, cast MXU operands to bf16."""
    w_in, b_in = params["in_projection"]        # (C, Dd), (1, C)
    w_t, b_t = params["t_projection"]           # (C, Ct), (1, C)
    w_out, b_out = params["out_projection"]     # (Dd, C), (1, Dd)

    half_dim = channels_t // 2
    emb_scale = math.log(max_positions) / (half_dim - 1)
    freqs = (max_positions *
             jnp.exp(jnp.arange(half_dim, dtype=jnp.float32) * (-emb_scale))
             ).reshape(1, half_dim)

    w_t_T = w_t.T                                # (Ct, C)
    # [W_in^T ; W_t^T[:hd] ; W_t^T[hd:2hd]]  -> single (Dd+2*hd, C) matrix.
    w_cat = jnp.concatenate([w_in.T, w_t_T[:half_dim], w_t_T[half_dim:2 * half_dim]],
                            axis=0)
    # [b_in + b_t, block biases...] -> (L+1, 1, C)
    biases = jnp.concatenate(
        [(b_in + b_t)[None], jnp.stack([b for (_, b) in params["blocks"]], axis=0)],
        axis=0)
    w_blk = jnp.stack([w.T for (w, _) in params["blocks"]], axis=0)  # (L, C, C)

    return {
        "freqs": freqs,                          # (1, hd)      f32
        "w_cat": w_cat.astype(mxu_dtype),        # (Dd+2hd, C)  bf16
        "biases": biases,                        # (L+1, 1, C)  f32
        "w_blk": w_blk.astype(mxu_dtype),        # (L, C, C)    bf16
        "w_out": jnp.asarray(w_out.T).astype(mxu_dtype),   # (C, Dd) bf16
        "b_out": b_out,                          # (1, Dd)      f32
    }


# ---------------------------------------------------------------------------
# Forward pass (single pallas_call, batch grid, weights VMEM-resident)
# ---------------------------------------------------------------------------

def _round_up(n, m):
    return ((n + m - 1) // m) * m


def mlp_forward(fused, x, t, *, block_m=256):
    B, channels_data = x.shape
    layers_p1, _, channels = fused["biases"].shape
    layers = layers_p1 - 1
    half_dim = fused["freqs"].shape[1]
    k_cat = fused["w_cat"].shape[0]

    # Batch tile: multiple of 8 sublanes, clamped to (padded) batch size.
    bm = min(block_m, _round_up(B, 8))
    num_blocks = pl.cdiv(B, bm)
    b_pad = num_blocks * bm

    t2 = t.astype(jnp.float32).reshape(B, 1)
    x_p = x
    if b_pad != B:
        x_p = jnp.pad(x, ((0, b_pad - B), (0, 0)))
        t2 = jnp.pad(t2, ((0, b_pad - B), (0, 0)))

    kernel = functools.partial(_mlp_fused_kernel, layers=layers)

    out = pl.pallas_call(
        kernel,
        out_shape=jax.ShapeDtypeStruct((b_pad, channels_data), x.dtype),
        grid=(num_blocks,),
        in_specs=[
            pl.BlockSpec((bm, channels_data), lambda i: (i, 0)),       # x tile
            pl.BlockSpec((bm, 1), lambda i: (i, 0)),                   # t tile
            pl.BlockSpec((1, half_dim), lambda i: (0, 0)),             # freqs
            pl.BlockSpec((k_cat, channels), lambda i: (0, 0)),         # w_cat
            pl.BlockSpec((layers + 1, 1, channels), lambda i: (0, 0, 0)),  # biases
            pl.BlockSpec((layers, channels, channels), lambda i: (0, 0, 0)),  # w_blk
            pl.BlockSpec((channels, channels_data), lambda i: (0, 0)),  # w_out
            pl.BlockSpec((1, channels_data), lambda i: (0, 0)),         # b_out
        ],
        out_specs=pl.BlockSpec((bm, channels_data), lambda i: (i, 0)),
        compiler_params=pltpu.CompilerParams(
            dimension_semantics=("parallel",)),
    )(x_p, t2, fused["freqs"], fused["w_cat"], fused["biases"],
      fused["w_blk"], fused["w_out"], fused["b_out"])

    return out[:B] if b_pad != B else out


# ---------------------------------------------------------------------------
# Main
# ---------------------------------------------------------------------------

if __name__ == "__main__":
    # Small shapes consistent with the module's signature (channels lane-aligned).
    B = 64
    channels_data = 32
    channels = 128
    channels_t = 64
    layers = 3
    max_positions = 10000

    key = jax.random.PRNGKey(0)
    k_params, k_x, k_t = jax.random.split(key, 3)

    params = init_mlp_params(k_params, channels_data, layers, channels, channels_t)
    fused = prepare_fused_params(params, channels_t, max_positions=max_positions)

    x = jax.random.normal(k_x, (B, channels_data), dtype=jnp.float32)
    t = jax.random.uniform(k_t, (B,), dtype=jnp.float32)   # diffusion t in [0, 1)

    out = mlp_forward(fused, x, t)
    out = jax.block_until_ready(out)

    # Pure-JAX references (same math, outside Pallas).
    def ref_forward(params, x, t, dot_dtype=None):
        def dot(a, b):
            if dot_dtype is not None:
                a = a.astype(dot_dtype)
                b = b.astype(dot_dtype)
            return jnp.dot(a, b, preferred_element_type=jnp.float32)

        w_in, b_in = params["in_projection"]
        w_t, b_t = params["t_projection"]
        w_out, b_out = params["out_projection"]
        half_dim = channels_t // 2
        emb_scale = math.log(max_positions) / (half_dim - 1)
        freqs = jnp.exp(jnp.arange(half_dim, dtype=jnp.float32) * (-emb_scale))
        prod = (t * max_positions)[:, None] * freqs[None, :]
        emb = jnp.concatenate([jnp.sin(prod), jnp.cos(prod)], axis=1)
        if emb.shape[1] < channels_t:
            emb = jnp.concatenate(
                [emb, jnp.zeros((emb.shape[0], channels_t - emb.shape[1]))], axis=1)
        h = dot(x, w_in.T) + b_in + dot(emb, w_t.T) + b_t
        for (w, b) in params["blocks"]:
            h = jnp.maximum(dot(h, w.T) + b, 0.0)
        return dot(h, w_out.T) + b_out

    ref_bf16 = ref_forward(params, x, t, dot_dtype=jnp.bfloat16)  # precision-matched
    ref_f32 = ref_forward(params, x, t)                           # full-precision

    assert out.shape == (B, channels_data), out.shape
    assert bool(jnp.all(jnp.isfinite(out)))
    assert bool(jnp.allclose(out, ref_bf16, atol=5e-3, rtol=5e-3))
    assert bool(jnp.allclose(out, ref_f32, atol=5e-2, rtol=5e-2))
    print("KERNEL_OK")
</pallas_src>

<mosaic_0001>
module attributes {stable_mosaic.version = 11 : i64} {
  func.func @_mlp_fused_kernel(%arg0: i32, %arg1: memref<64x32xf32, #tpu.memory_space<vmem>>, %arg2: memref<64x1xf32, #tpu.memory_space<vmem>>, %arg3: memref<1x32xf32, #tpu.memory_space<vmem>>, %arg4: memref<96x128xbf16, #tpu.memory_space<vmem>>, %arg5: memref<4x1x128xf32, #tpu.memory_space<vmem>>, %arg6: memref<3x128x128xbf16, #tpu.memory_space<vmem>>, %arg7: memref<128x32xbf16, #tpu.memory_space<vmem>>, %arg8: memref<1x32xf32, #tpu.memory_space<vmem>>, %arg9: memref<64x32xf32, #tpu.memory_space<vmem>>) attributes {dimension_semantics = [#tpu.dimension_semantics<parallel>], iteration_bounds = array<i64: 1>, scalar_prefetch = 0 : i64, scratch_operands = 0 : i64, tpu.core_type = #tpu.core_type<tc>, window_params = [{transform_indices = @transform_0, window_bounds = array<i64: 64, 32>}, {transform_indices = @transform_1, window_bounds = array<i64: 64, 1>}, {pipeline_mode = #tpu.pipeline_mode<synchronous>, transform_indices = @transform_2, window_bounds = array<i64: 1, 32>}, {pipeline_mode = #tpu.pipeline_mode<synchronous>, transform_indices = @transform_3, window_bounds = array<i64: 96, 128>}, {pipeline_mode = #tpu.pipeline_mode<synchronous>, transform_indices = @transform_4, window_bounds = array<i64: 4, 1, 128>}, {pipeline_mode = #tpu.pipeline_mode<synchronous>, transform_indices = @transform_5, window_bounds = array<i64: 3, 128, 128>}, {pipeline_mode = #tpu.pipeline_mode<synchronous>, transform_indices = @transform_6, window_bounds = array<i64: 128, 32>}, {pipeline_mode = #tpu.pipeline_mode<synchronous>, transform_indices = @transform_7, window_bounds = array<i64: 1, 32>}, {transform_indices = @transform_8, window_bounds = array<i64: 64, 32>}]} {
    %c0 = arith.constant 0 : index
    %c0_0 = arith.constant 0 : index
    %0 = vector.load %arg2[%c0, %c0_0] : memref<64x1xf32, #tpu.memory_space<vmem>>, vector<64x1xf32>
    %c0_1 = arith.constant 0 : index
    %c0_2 = arith.constant 0 : index
    %1 = vector.load %arg3[%c0_1, %c0_2] : memref<1x32xf32, #tpu.memory_space<vmem>>, vector<1x32xf32>
    %2 = vector.broadcast %0 : vector<64x1xf32> to vector<64x32xf32>
    %3 = vector.broadcast %1 : vector<1x32xf32> to vector<64x32xf32>
    %4 = arith.mulf %2, %3 : vector<64x32xf32>
    %c0_3 = arith.constant 0 : index
    %c0_4 = arith.constant 0 : index
    %5 = vector.load %arg1[%c0_3, %c0_4] : memref<64x32xf32, #tpu.memory_space<vmem>>, vector<64x32xf32>
    %6 = math.sin %4 : vector<64x32xf32>
    %7 = math.cos %4 : vector<64x32xf32>
    %8 = tpu.concatenate %5, %6, %7 in 1 : vector<64x32xf32>, vector<64x32xf32>, vector<64x32xf32> -> vector<64x96xf32>
    %9 = arith.truncf %8 : vector<64x96xf32> to vector<64x96xbf16>
    %c0_5 = arith.constant 0 : index
    %c0_6 = arith.constant 0 : index
    %10 = vector.load %arg4[%c0_5, %c0_6] : memref<96x128xbf16, #tpu.memory_space<vmem>>, vector<96x128xbf16>
    %cst = arith.constant dense<0.000000e+00> : vector<64x128xf32>
    %11 = tpu.matmul %9, %10, %cst {dimension_numbers = #tpu.dot_dimension_numbers<[1], [0], [0], [1], [0, 0, 1, 1], [], []>} : vector<64x96xbf16>, vector<96x128xbf16>, vector<64x128xf32> -> vector<64x128xf32>
    %c0_7 = arith.constant 0 : index
    %c0_8 = arith.constant 0 : index
    %c0_9 = arith.constant 0 : index
    %12 = vector.load %arg5[%c0_7, %c0_8, %c0_9] : memref<4x1x128xf32, #tpu.memory_space<vmem>>, vector<1x1x128xf32>
    %13 = vector.shape_cast %12 : vector<1x1x128xf32> to vector<1x128xf32>
    %14 = vector.broadcast %13 : vector<1x128xf32> to vector<64x128xf32>
    %15 = arith.addf %11, %14 : vector<64x128xf32>
    %16 = arith.truncf %15 : vector<64x128xf32> to vector<64x128xbf16>
    %c0_10 = arith.constant 0 : index
    %c0_11 = arith.constant 0 : index
    %c0_12 = arith.constant 0 : index
    %17 = vector.load %arg6[%c0_10, %c0_11, %c0_12] : memref<3x128x128xbf16, #tpu.memory_space<vmem>>, vector<1x128x128xbf16>
    %18 = vector.shape_cast %17 : vector<1x128x128xbf16> to vector<128x128xbf16>
    %cst_13 = arith.constant dense<0.000000e+00> : vector<64x128xf32>
    %19 = tpu.matmul %16, %18, %cst_13 {dimension_numbers = #tpu.dot_dimension_numbers<[1], [0], [0], [1], [0, 0, 1, 1], [], []>} : vector<64x128xbf16>, vector<128x128xbf16>, vector<64x128xf32> -> vector<64x128xf32>
    %c1 = arith.constant 1 : index
    %c0_14 = arith.constant 0 : index
    %c0_15 = arith.constant 0 : index
    %20 = vector.load %arg5[%c1, %c0_14, %c0_15] : memref<4x1x128xf32, #tpu.memory_space<vmem>>, vector<1x1x128xf32>
    %21 = vector.shape_cast %20 : vector<1x1x128xf32> to vector<1x128xf32>
    %22 = vector.broadcast %21 : vector<1x128xf32> to vector<64x128xf32>
    %23 = arith.addf %19, %22 : vector<64x128xf32>
    %cst_16 = arith.constant 0.000000e+00 : f32
    %24 = vector.broadcast %cst_16 : f32 to vector<64x128xf32>
    %25 = arith.maximumf %23, %24 : vector<64x128xf32>
    %26 = arith.truncf %25 : vector<64x128xf32> to vector<64x128xbf16>
    %c1_17 = arith.constant 1 : index
    %c0_18 = arith.constant 0 : index
    %c0_19 = arith.constant 0 : index
    %27 = vector.load %arg6[%c1_17, %c0_18, %c0_19] : memref<3x128x128xbf16, #tpu.memory_space<vmem>>, vector<1x128x128xbf16>
    %28 = vector.shape_cast %27 : vector<1x128x128xbf16> to vector<128x128xbf16>
    %cst_20 = arith.constant dense<0.000000e+00> : vector<64x128xf32>
    %29 = tpu.matmul %26, %28, %cst_20 {dimension_numbers = #tpu.dot_dimension_numbers<[1], [0], [0], [1], [0, 0, 1, 1], [], []>} : vector<64x128xbf16>, vector<128x128xbf16>, vector<64x128xf32> -> vector<64x128xf32>
    %c2 = arith.constant 2 : index
    %c0_21 = arith.constant 0 : index
    %c0_22 = arith.constant 0 : index
    %30 = vector.load %arg5[%c2, %c0_21, %c0_22] : memref<4x1x128xf32, #tpu.memory_space<vmem>>, vector<1x1x128xf32>
    %31 = vector.shape_cast %30 : vector<1x1x128xf32> to vector<1x128xf32>
    %32 = vector.broadcast %31 : vector<1x128xf32> to vector<64x128xf32>
    %33 = arith.addf %29, %32 : vector<64x128xf32>
    %cst_23 = arith.constant 0.000000e+00 : f32
    %34 = vector.broadcast %cst_23 : f32 to vector<64x128xf32>
    %35 = arith.maximumf %33, %34 : vector<64x128xf32>
    %36 = arith.truncf %35 : vector<64x128xf32> to vector<64x128xbf16>
    %c2_24 = arith.constant 2 : index
    %c0_25 = arith.constant 0 : index
    %c0_26 = arith.constant 0 : index
    %37 = vector.load %arg6[%c2_24, %c0_25, %c0_26] : memref<3x128x128xbf16, #tpu.memory_space<vmem>>, vector<1x128x128xbf16>
    %38 = vector.shape_cast %37 : vector<1x128x128xbf16> to vector<128x128xbf16>
    %cst_27 = arith.constant dense<0.000000e+00> : vector<64x128xf32>
    %39 = tpu.matmul %36, %38, %cst_27 {dimension_numbers = #tpu.dot_dimension_numbers<[1], [0], [0], [1], [0, 0, 1, 1], [], []>} : vector<64x128xbf16>, vector<128x128xbf16>, vector<64x128xf32> -> vector<64x128xf32>
    %c3 = arith.constant 3 : index
    %c0_28 = arith.constant 0 : index
    %c0_29 = arith.constant 0 : index
    %40 = vector.load %arg5[%c3, %c0_28, %c0_29] : memref<4x1x128xf32, #tpu.memory_space<vmem>>, vector<1x1x128xf32>
    %41 = vector.shape_cast %40 : vector<1x1x128xf32> to vector<1x128xf32>
    %42 = vector.broadcast %41 : vector<1x128xf32> to vector<64x128xf32>
    %43 = arith.addf %39, %42 : vector<64x128xf32>
    %cst_30 = arith.constant 0.000000e+00 : f32
    %44 = vector.broadcast %cst_30 : f32 to vector<64x128xf32>
    %45 = arith.maximumf %43, %44 : vector<64x128xf32>
    %46 = arith.truncf %45 : vector<64x128xf32> to vector<64x128xbf16>
    %c0_31 = arith.constant 0 : index
    %c0_32 = arith.constant 0 : index
    %47 = vector.load %arg7[%c0_31, %c0_32] : memref<128x32xbf16, #tpu.memory_space<vmem>>, vector<128x32xbf16>
    %cst_33 = arith.constant dense<0.000000e+00> : vector<64x32xf32>
    %48 = tpu.matmul %46, %47, %cst_33 {dimension_numbers = #tpu.dot_dimension_numbers<[1], [0], [0], [1], [0, 0, 1, 1], [], []>} : vector<64x128xbf16>, vector<128x32xbf16>, vector<64x32xf32> -> vector<64x32xf32>
    %c0_34 = arith.constant 0 : index
    %c0_35 = arith.constant 0 : index
    %49 = vector.load %arg8[%c0_34, %c0_35] : memref<1x32xf32, #tpu.memory_space<vmem>>, vector<1x32xf32>
    %50 = vector.broadcast %49 : vector<1x32xf32> to vector<64x32xf32>
    %51 = arith.addf %48, %50 : vector<64x32xf32>
    %c0_36 = arith.constant 0 : index
    %c0_37 = arith.constant 0 : index
    %52 = vector.load %arg9[%c0_36, %c0_37] : memref<64x32xf32, #tpu.memory_space<vmem>>, vector<64x32xf32>
    tpu.vector_store %arg9[%c0_36, %c0_37], %51 {strides = array<i32>} : memref<64x32xf32, #tpu.memory_space<vmem>>, vector<64x32xf32>,
    return
  }
  func.func @transform_0(%arg0: i32) -> (i32, i32) {
    %c0_i32 = arith.constant 0 : i32
    %c0_i32_0 = arith.constant 0 : i32
    return %arg0, %c0_i32 : i32, i32
  }
  func.func @transform_1(%arg0: i32) -> (i32, i32) {
    %c0_i32 = arith.constant 0 : i32
    %c0_i32_0 = arith.constant 0 : i32
    return %arg0, %c0_i32 : i32, i32
  }
  func.func @transform_2(%arg0: i32) -> (i32, i32) {
    %c0_i32 = arith.constant 0 : i32
    %c0_i32_0 = arith.constant 0 : i32
    %c0_i32_1 = arith.constant 0 : i32
    return %c0_i32, %c0_i32_0 : i32, i32
  }
  func.func @transform_3(%arg0: i32) -> (i32, i32) {
    %c0_i32 = arith.constant 0 : i32
    %c0_i32_0 = arith.constant 0 : i32
    %c0_i32_1 = arith.constant 0 : i32
    return %c0_i32, %c0_i32_0 : i32, i32
  }
  func.func @transform_4(%arg0: i32) -> (i32, i32, i32) {
    %c0_i32 = arith.constant 0 : i32
    %c0_i32_0 = arith.constant 0 : i32
    %c0_i32_1 = arith.constant 0 : i32
    %c0_i32_2 = arith.constant 0 : i32
    return %c0_i32, %c0_i32_0, %c0_i32_1 : i32, i32, i32
  }
  func.func @transform_5(%arg0: i32) -> (i32, i32, i32) {
    %c0_i32 = arith.constant 0 : i32
    %c0_i32_0 = arith.constant 0 : i32
    %c0_i32_1 = arith.constant 0 : i32
    %c0_i32_2 = arith.constant 0 : i32
    return %c0_i32, %c0_i32_0, %c0_i32_1 : i32, i32, i32
  }
  func.func @transform_6(%arg0: i32) -> (i32, i32) {
    %c0_i32 = arith.constant 0 : i32
    %c0_i32_0 = arith.constant 0 : i32
    %c0_i32_1 = arith.constant 0 : i32
    return %c0_i32, %c0_i32_0 : i32, i32
  }
  func.func @transform_7(%arg0: i32) -> (i32, i32) {
    %c0_i32 = arith.constant 0 : i32
    %c0_i32_0 = arith.constant 0 : i32
    %c0_i32_1 = arith.constant 0 : i32
    return %c0_i32, %c0_i32_0 : i32, i32
  }
  func.func @transform_8(%arg0: i32) -> (i32, i32) {
    %c0_i32 = arith.constant 0 : i32
    %c0_i32_0 = arith.constant 0 : i32
    return %arg0, %c0_i32 : i32, i32
  }
}

</mosaic_0001>

<bundles_post_ra>
// kernel: tpu_custom_call.1
= control target key start
LH: loop header
LB: loop body
LE: loop exit
PB: predicated region body
PF: predicated region fallthrough
CT: control target
= control target key end

     0   :  { %v3051_v0 = vmov 0   ;;  %v3052_v48 = vmov 683565275   ;;  %v3053_v50 = vmov 2475754826   ;;  %s3058_s9 = smov 32   ;;  %s4121_s1 = inlined_call_operand.vmem [shape: f32[64,1], index: 1, kind: input, shape index: {}]   ;;  %s4122_s2 = inlined_call_operand.vmem [shape: f32[1,32], index: 2, kind: input, shape index: {}]   ;;  %s4123_s3 = inlined_call_operand.vmem [shape: bf16[96,128], index: 3, kind: input, shape index: {}]   ;;  %s4124_s5 = inlined_call_operand.vmem [shape: bf16[3,128,128], index: 5, kind: input, shape index: {}]   ;;  %s4125_s0 = inlined_call_operand.vmem [shape: f32[64,32], index: 0, kind: input, shape index: {}]   ;;  %s4126_s4 = inlined_call_operand.vmem [shape: f32[4,1,128], index: 4, kind: input, shape index: {}]   ;;  %s4127_s6 = inlined_call_operand.vmem [shape: bf16[128,32], index: 6, kind: input, shape index: {}]   ;;  %s4128_s7 = inlined_call_operand.vmem [shape: f32[1,32], index: 7, kind: input, shape index: {}]   ;;  %s4129_s8 = inlined_call_operand.vmem [shape: f32[64,32], index: 8, kind: output, shape index: {}]  }
   0x1   :  { %2940 = vset.pattern.permute.xlu1 %v3051_v0  ;;  %2939 = vset.pattern.permute.xlu0 %v3051_v0  ;;  %v32_v1 = vld [vmem:[%s4121_s1 + $0x10] sm:$0xff]  ;;  %v30_v2 = vld [vmem:[%s4121_s1] sm:$0xff]  ;;  %v33_v3 = vld [vmem:[%s4121_s1 + $0x18] sm:$0xff]  ;;  %v3054_v53 = vmov 2131351028  }
   0x2   :  { %51 = vperm.xlu1 %2940, %v32_v1   ;;  %41 = vperm.xlu0 %2939, %v30_v2   ;;  %v31_v4 = vld [vmem:[%s4121_s1 + $0x8] sm:$0xff]  ;;  %v34_v6 = vld [vmem:[%s4121_s1 + $0x20] sm:$0xff]  ;;  %v37_v7 = vld [vmem:[%s4121_s1 + $0x38] sm:$0xff]  ;;  %v3055_v55 = vmov 2102212464  }
   0x3   :  { %v35_v5 = vld [vmem:[%s4121_s1 + $0x28] sm:$0xff]  ;;  %v36_v8 = vld [vmem:[%s4121_s1 + $0x30] sm:$0xff]  ;;  %v3132_v9 = vld [vmem:[%s4122_s2] ss:$0 sm:$0xff]  ;;  %v3056_v57 = vmov 920167782  }
   0x4   :  { %v4132_v0 = vmov 1326507024  }
   0x6   :  { %56 = vperm.xlu1 %2940, %v33_v3   ;;  %46 = vperm.xlu0 %2939, %v31_v4  }
   0xa   :  { %66 = vperm.xlu1 %2940, %v35_v5   ;;  %61 = vperm.xlu0 %2939, %v34_v6  }
   0xe   :  { %76 = vperm.xlu1 %2940, %v37_v7   ;;  %71 = vperm.xlu0 %2939, %v36_v8  }
  0x81   :  { %v52_v10 = vpop.permute.xlu1 %51  ;;  %v42_v11 = vpop.permute.xlu0 %41 }
  0x82   :  { %v3135_v12 = vmul.f32 %v3132_v9, %v52_v10  ;;  %v3138_v13 = vmul.f32 %v3132_v9, %v42_v11 }
  0x84   :  { %v309_v14 = vand.u32 2147483647, %v3135_v12  ;;  %v312_v15 = vand.u32 2139095040, %v3135_v12  ;;  %v101_v16 = vand.u32 2147483647, %v3138_v13  ;;  %v104_v17 = vand.u32 2139095040, %v3138_v13 }
  0x85   :  { %v57_v18 = vpop.permute.xlu1 %56  ;;  %v47_v22 = vpop.permute.xlu0 %46 }
  0x86   :  { %v313_v19 = vshrl.u32 %v312_v15, 23  ;;  %v316_v20 = vand.u32 8388607, %v309_v14  ;;  %v3147_v21 = vmul.f32 %v3132_v9, %v57_v18  ;;  %v105_v23 = vshrl.u32 %v104_v17, 23 }
  0x87   :  { %v108_v24 = vand.u32 8388607, %v101_v16  ;;  %v3154_v29 = vmul.f32 %v3132_v9, %v47_v22 }
  0x88   :  { %v2586_v25 = vadd.s32 4294967169, %v313_v19  ;;  %v413_v26 = vand.u32 2147483647, %v3147_v21  ;;  %v2578_v27 = vadd.s32 4294967169, %v105_v23  ;;  %v416_v28 = vand.u32 2139095040, %v3147_v21 }
  0x89   :  { %v317_v30 = vor.u32 8388608, %v316_v20  ;;  %v109_v32 = vor.u32 8388608, %v108_v24  ;;  %v205_v38 = vand.u32 2147483647, %v3154_v29 }
  0x8a   :  { %v319_v31 = vadd.s32 1, %v2586_v25  ;;  %v111_v33 = vadd.s32 1, %v2578_v27  ;;  %v417_v34 = vshrl.u32 %v416_v28, 23  ;;  %v3158_v35 = vand.u32 8388607, %v413_v26 }
  0x8b   :  { %v3161_v41 = vshll.u32 %v317_v30, 8  ;;  %v3165_v45 = vshll.u32 %v109_v32, 8 }
  0x8c   :  { %vm320_vm0 = vcmp.gt.s32.totalorder %v319_v31, 0  ;;  %vm112_vm1 = vcmp.gt.s32.totalorder %v111_v33, 0  ;;  %v2590_v37 = vadd.s32 4294967169, %v417_v34  ;;  %v421_v46 = vor.u32 8388608, %v3158_v35 }
  0x8d   :  { %v321_v36 = vsel %vm320_vm0, %v319_v31, 0  ;;  %v113_v42 = vsel %vm112_vm1, %v111_v33, 0 }
  0x8e   :  { %v322_v39 = vshrl.u32 %v321_v36, 5  ;;  %v323_v40 = vand.u32 31, %v321_v36  ;;  %v3163_v43 = vshrl.u32 %v113_v42, 5  ;;  %v115_v44 = vand.u32 31, %v113_v42 }
  0x8f   :  { %v3170_v52 = vadd.s32 1, %v2590_v37 }
  0x90   :  { %v324_v47 = vsub.s32 32, %v323_v40  ;;  %v326_v49 = vshll.u32 %v3052_v48, %v323_v40  ;;  %v329_v51 = vshll.u32 %v3053_v50, %v323_v40  ;;  %v332_v54 = vshll.u32 %v3054_v53, %v323_v40 }
  0x91   :  { %v335_v56 = vshll.u32 %v3055_v55, %v323_v40  ;;  %v338_v58 = vshll.u32 %v3056_v57, %v323_v40  ;;  %vm341_vm2 = vcmp.lt.s32.totalorder %v322_v39, 1  ;;  %vm342_vm3 = vcmp.lt.s32.totalorder %v322_v39, 2 }
  0x92   :  { %v327_v59 = vshrl.u32 %v3053_v50, %v324_v47  ;;  %v330_v60 = vshrl.u32 %v3054_v53, %v324_v47  ;;  %v333_v61 = vshrl.u32 %v3055_v55, %v324_v47  ;;  %v325_v62 = vshrl.u32 %v3052_v48, %v324_v47 }
  0x93   :  { %v336_v63 = vshrl.u32 %v3056_v57, %v324_v47  ;;  %v339_v1 = vshrl.u32 %v4132_v0, %v324_v47  ;;  %vm343_vm4 = vcmp.lt.s32.totalorder %v322_v39, 3  ;;  %v116_v5 = vsub.s32 32, %v115_v44 }
  0x94   :  { %v328_v2 = vor.u32 %v327_v59, %v326_v49  ;;  %v331_v3 = vor.u32 %v330_v60, %v329_v51  ;;  %v334_v4 = vor.u32 %v333_v61, %v332_v54  ;;  %vm344_vm5 = vcmp.lt.s32.totalorder %v322_v39, 4 }
  0x95   :  { %v337_v6 = vor.u32 %v336_v63, %v335_v56  ;;  %v340_v7 = vor.u32 %v339_v1, %v338_v58  ;;  %v118_v8 = vshll.u32 %v3052_v48, %v115_v44  ;;  %v121_v22 = vshll.u32 %v3053_v50, %v115_v44 }
  0x96   :  { %v345_v10 = vsel %vm341_vm2, %v325_v62, %v328_v2  ;;  %v346_v11 = vsel %vm344_vm5, %v334_v4, 2102212464  ;;  %v349_v15 = vsel %vm341_vm2, %v328_v2, %v331_v3  ;;  %v353_v17 = vsel %vm341_vm2, %v331_v3, %v334_v4 }
  0x97   :  { %v347_v18 = vsel %vm343_vm4, %v331_v3, %v346_v11  ;;  %v350_v19 = vsel %vm344_vm5, %v337_v6, 920167782  ;;  %v354_v20 = vsel %vm344_vm5, %v340_v7, 1326507024  ;;  %v117_v25 = vshrl.u32 %v3052_v48, %v116_v5 }
  0x98   :  { %v351_v23 = vsel %vm343_vm4, %v334_v4, %v350_v19  ;;  %v355_v24 = vsel %vm343_vm4, %v337_v6, %v354_v20  ;;  %v119_v27 = vshrl.u32 %v3053_v50, %v116_v5  ;;  %v348_v28 = vsel %vm342_vm3, %v345_v10, %v347_v18 }
  0x99   :  { %v352_v30 = vsel %vm342_vm3, %v349_v15, %v351_v23  ;;  %v356_v31 = vsel %vm342_vm3, %v353_v17, %v355_v24  ;;  %v122_v32 = vshrl.u32 %v3054_v53, %v116_v5  ;;  %v124_v47 = vshll.u32 %v3054_v53, %v115_v44 }
  0x9a   :  { %v3196_v33 = vmul.u32.u64.low %v3161_v41, %v356_v31  ;;  %v3197_v34 = vmul.u32.u64.high %v3161_v41, %v356_v31, %v3196_v33  ;;  %v3200_v36 = vmul.u32.u64.low %v3161_v41, %v352_v30  ;;  %v3201_v37 = vmul.u32.u64.high %v3161_v41, %v352_v30, %v3200_v36 }
  0x9b   :  { %v120_v40 = vor.u32 %v119_v27, %v118_v8  ;;  %v123_v42 = vor.u32 %v122_v32, %v121_v22  ;;  %v125_v49 = vshrl.u32 %v3055_v55, %v116_v5  ;;  %v364_v51 = vmul.u32 %v3161_v41, %v348_v28 }
  0x9c   :  { %v127_v39 = vshll.u32 %v3055_v55, %v115_v44  ;;  %v128_v54 = vshrl.u32 %v3056_v57, %v116_v5  ;;  %v131_v56 = vshrl.u32 %v4132_v0, %v116_v5  ;;  %v130_v59 = vshll.u32 %v3056_v57, %v115_v44 }
  0x9d   :  { %v126_v58 = vor.u32 %v125_v49, %v124_v47  ;;  %vm133_vm6 = vcmp.lt.s32.totalorder %v3163_v43, 1  ;;  %vm134_vm7 = vcmp.lt.s32.totalorder %v3163_v43, 2  ;;  %vm366_vm8 = vc.u32 %v3197_v34, %v3200_v36 }
  0x9e   :  { %v367_v60 = vadd.s32 1, %v3201_v37  ;;  %v129_v61 = vor.u32 %v128_v54, %v127_v39  ;;  %vm135_vm9 = vcmp.lt.s32.totalorder %v3163_v43, 3  ;;  %v132_v41 = vor.u32 %v131_v56, %v130_v59 }
  0x9f   :  { %vm136_vm10 = vcmp.lt.s32.totalorder %v3163_v43, 4  ;;  %v137_v62 = vsel %vm133_vm6, %v117_v25, %v120_v40  ;;  %v141_v63 = vsel %vm133_vm6, %v120_v40, %v123_v42  ;;  %v145_v3 = vsel %vm133_vm6, %v123_v42, %v126_v58 }
  0xa0   :  { %v368_v1 = vsel %vm366_vm8, %v367_v60, %v3201_v37  ;;  %v138_v2 = vsel %vm136_vm10, %v126_v58, 2102212464  ;;  %v142_v44 = vsel %vm136_vm10, %v129_v61, 920167782  ;;  %v146_v7 = vsel %vm136_vm10, %v132_v41, 1326507024 }
  0xa1   :  { %v369_v4 = vadd.s32 %v368_v1, %v364_v51  ;;  %v139_v5 = vsel %vm135_vm9, %v123_v42, %v138_v2  ;;  %v143_v6 = vsel %vm135_vm9, %v126_v58, %v142_v44  ;;  %v147_v10 = vsel %vm135_vm9, %v129_v61, %v146_v7 }
  0xa2   :  { %v144_v8 = vsel %vm134_vm7, %v141_v63, %v143_v6  ;;  %vm424_vm11 = vcmp.gt.s32.totalorder %v3170_v52, 0  ;;  %v208_v11 = vand.u32 2139095040, %v3154_v29  ;;  %v148_v17 = vsel %vm134_vm7, %v145_v3, %v147_v10 }
  0xa3   :  { %v370_v15 = vadd.s32 536870912, %v369_v4  ;;  %v3224_v18 = vmul.u32.u64.low %v3165_v45, %v144_v8  ;;  %v3225_v19 = vmul.u32.u64.high %v3165_v45, %v144_v8, %v3224_v18  ;;  %v140_v20 = vsel %vm134_vm7, %v137_v62, %v139_v5 }
  0xa4   :  { %v3231_v22 = vmul.u32.u64.low %v3165_v45, %v148_v17  ;;  %v3232_v23 = vmul.u32.u64.high %v3165_v45, %v148_v17, %v3231_v22  ;;  %v425_v24 = vsel %vm424_vm11, %v3170_v52, 0  ;;  %v3238_v28 = vadd.s32 %v3200_v36, %v3197_v34 }
  0xa5   :  { %v3235_v25 = vshrl.u32 %v370_v15, 30  ;;  %v427_v27 = vand.u32 31, %v425_v24  ;;  %v3242_v30 = vshll.u32 %v421_v46, 8  ;;  %v209_v31 = vshrl.u32 %v208_v11, 23 }
  0xa6   :  { %v3246_v43 = vand.u32 8388607, %v205_v38  ;;  %v156_v33 = vmul.u32 %v3165_v45, %v140_v20  ;;  %v159_v52 = vadd.s32 1, %v3225_v19  ;;  %vm158_vm12 = vc.u32 %v3232_v23, %v3224_v18 }
  0xa7   :  { %v372_v32 = vshll.u32 %v3235_v25, 30  ;;  %v428_v37 = vsub.s32 32, %v427_v27  ;;  %v426_v34 = vshrl.u32 %v425_v24, 5  ;;  %v430_v35 = vshll.u32 %v3052_v48, %v427_v27 }
  0xa8   :  { %v433_v46 = vshll.u32 %v3053_v50, %v427_v27  ;;  %v160_v40 = vsel %vm158_vm12, %v159_v52, %v3225_v19  ;;  %v436_v47 = vshll.u32 %v3054_v53, %v427_v27  ;;  %v439_v39 = vshll.u32 %v3055_v55, %v427_v27 }
  0xa9   :  { %v3255_v36 = vsub.s32 %v369_v4, %v372_v32  ;;  %v431_v42 = vshrl.u32 %v3053_v50, %v428_v37  ;;  %v161_v45 = vadd.s32 %v160_v40, %v156_v33  ;;  %v434_v49 = vshrl.u32 %v3054_v53, %v428_v37 }
  0xaa   :  { %v437_v51 = vshrl.u32 %v3055_v55, %v428_v37  ;;  %v440_v58 = vshrl.u32 %v3056_v57, %v428_v37  ;;  %v442_v59 = vshll.u32 %v3056_v57, %v427_v27  ;;  %v443_v62 = vshrl.u32 %v4132_v0, %v428_v37 }
  0xab   :  { %v375_v54 = vsub.s32 0, %v3255_v36  ;;  %v432_v56 = vor.u32 %v431_v42, %v430_v35  ;;  %v162_v60 = vadd.s32 536870912, %v161_v45  ;;  %v435_v61 = vor.u32 %v434_v49, %v433_v46 }
  0xac   :  { %v438_v41 = vor.u32 %v437_v51, %v436_v47  ;;  %v429_v1 = vshrl.u32 %v3052_v48, %v428_v37  ;;  %v441_v2 = vor.u32 %v440_v58, %v439_v39  ;;  %v2582_v44 = vadd.s32 4294967169, %v209_v31  ;;  %v67_v37 = vpop.permute.xlu1 %66 }
  0xad   :  { %v2587_v63 = vmin.u32 %v375_v54, %v3255_v36  ;;  %v3269_v3 = vshrl.u32 %v162_v60, 30  ;;  %v444_v4 = vor.u32 %v443_v62, %v442_v59  ;;  %vm445_vm13 = vcmp.lt.s32.totalorder %v426_v34, 1 }
  0xae   :  { %vm448_vm14 = vcmp.lt.s32.totalorder %v426_v34, 4  ;;  %vm446_vm15 = vcmp.lt.s32.totalorder %v426_v34, 2  ;;  %v453_v7 = vsel %vm445_vm13, %v432_v56, %v435_v61  ;;  %vm447_vm0 = vcmp.lt.s32.totalorder %v426_v34, 3 }
  0xaf   :  { %v377_v5 = vclz %v2587_v63  ;;  %v450_v6 = vsel %vm448_vm14, %v438_v41, 2102212464  ;;  %v164_v8 = vshll.u32 %v3269_v3, 30  ;;  %v454_v10 = vsel %vm448_vm14, %v441_v2, 920167782 }
  0xb0   :  { %v457_v11 = vsel %vm445_vm13, %v435_v61, %v438_v41  ;;  %v449_v17 = vsel %vm445_vm13, %v429_v1, %v432_v56  ;;  %v455_v19 = vsel %vm447_vm0, %v438_v41, %v454_v10  ;;  %v458_v20 = vsel %vm448_vm14, %v444_v4, 1326507024 }
  0xb1   :  { %v2588_v15 = vadd.s32 4294967294, %v377_v5  ;;  %v3272_v22 = vsub.s32 %v161_v45, %v164_v8  ;;  %v451_v24 = vsel %vm447_vm0, %v435_v61, %v450_v6  ;;  %v456_v27 = vsel %vm446_vm15, %v453_v7, %v455_v19 }
  0xb2   :  { %v459_v31 = vsel %vm447_vm0, %v441_v2, %v458_v20  ;;  %v3277_v33 = vmul.u32.u64.low %v3242_v30, %v456_v27  ;;  %v3278_v52 = vmul.u32.u64.high %v3242_v30, %v456_v27, %v3277_v33  ;;  %v452_v49 = vsel %vm446_vm15, %v449_v17, %v451_v24 }
  0xb3   :  { %vm2589_vm1 = vcmp.lt.s32.totalorder %v2588_v15, 0  ;;  %v460_v32 = vsel %vm446_vm15, %v457_v11, %v459_v31  ;;  %v167_v46 = vsub.s32 0, %v3272_v22  ;;  %v215_v51 = vadd.s32 1, %v2582_v44 }
  0xb4   :  { %v380_v35 = vsel %vm2589_vm1, 0, %v2588_v15  ;;  %v3283_v40 = vmul.u32.u64.low %v3242_v30, %v460_v32  ;;  %v3284_v42 = vmul.u32.u64.high %v3242_v30, %v460_v32, %v3283_v40  ;;  %v213_v56 = vor.u32 8388608, %v3246_v43 }
  0xb5   :  { %v381_v47 = vsub.s32 32, %v380_v35  ;;  %v385_v45 = vsub.s32 4294967266, %v380_v35  ;;  %v382_v39 = vshll.u32 %v3255_v36, %v380_v35  ;;  %v2579_v54 = vmin.u32 %v167_v46, %v3272_v22 }
  0xb6   :  { %v3291_v58 = vmul.f32 %v3132_v9, %v67_v37  ;;  %v471_v61 = vadd.s32 1, %v3278_v52  ;;  %vm216_vm2 = vcmp.gt.s32.totalorder %v215_v51, 0  ;;  %v468_v34 = vmul.u32 %v3242_v30, %v452_v49 }
  0xb7   :  { %v383_v59 = vshrl.u32 %v3238_v28, %v381_v47  ;;  %v386_v60 = vadd.s32 127, %v385_v45  ;;  %v169_v41 = vclz %v2579_v54  ;;  %vm470_vm3 = vc.u32 %v3284_v42, %v3277_v33 }
  0xb8   :  { %v217_v36 = vsel %vm216_vm2, %v215_v51, 0  ;;  %v472_v43 = vsel %vm470_vm3, %v471_v61, %v3278_v52  ;;  %v157_v28 = vadd.s32 %v3224_v18, %v3232_v23  ;;  %v3301_v5 = vshll.u32 %v213_v56, 8 }
  0xb9   :  { %v384_v62 = vor.u32 %v383_v59, %v382_v39  ;;  %v387_v63 = vshll.u32 %v386_v60, 23  ;;  %v2580_v1 = vadd.s32 4294967294, %v169_v41  ;;  %v473_v2 = vadd.s32 %v472_v43, %v468_v34 }
  0xba   :  { %v219_v44 = vand.u32 31, %v217_v36  ;;  %v621_v7 = vand.u32 2147483647, %v3291_v58  ;;  %v3304_v15 = vshrl.u32 %v217_v36, 5  ;;  %vm311_vm5 = vcmp.lt.s32.totalorder %v3135_v12, 0 }
  0xbb   :  { %v388_v4 = vor.u32 4788187, %v387_v63  ;;  %vm2581_vm4 = vcmp.lt.s32.totalorder %v2580_v1, 0  ;;  %v474_v6 = vadd.s32 536870912, %v473_v2  ;;  %v391_v10 = vcvt.s32.f32 %v384_v62 }
  0xbc   :  { %v220_v30 = vsub.s32 32, %v219_v44  ;;  %v172_v11 = vsel %vm2581_vm4, 0, %v2580_v1  ;;  %v222_v24 = vshll.u32 %v3052_v48, %v219_v44  ;;  %v225_v27 = vshll.u32 %v3053_v50, %v219_v44 }
  0xbd   :  { %v389_v8 = vand.u32 2147483647, %v388_v4  ;;  %v173_v17 = vsub.s32 32, %v172_v11  ;;  %v177_v19 = vsub.s32 4294967266, %v172_v11  ;;  %v3306_v20 = vshrl.u32 %v474_v6, 30 }
  0xbe   :  { %v174_v18 = vshll.u32 %v3272_v22, %v172_v11  ;;  %v223_v23 = vshrl.u32 %v3053_v50, %v220_v30  ;;  %v226_v31 = vshrl.u32 %v3054_v53, %v220_v30  ;;  %v229_v35 = vshrl.u32 %v3055_v55, %v220_v30 }
  0xbf   :  { %v175_v32 = vshrl.u32 %v157_v28, %v173_v17  ;;  %v178_v52 = vadd.s32 127, %v177_v19  ;;  %v476_v37 = vshll.u32 %v3306_v20, 30  ;;  %v392_v46 = vmul.f32 %v391_v10, %v389_v8 }
  0xc0   :  { %v224_v40 = vor.u32 %v223_v23, %v222_v24  ;;  %v227_v47 = vor.u32 %v226_v31, %v225_v27  ;;  %v228_v45 = vshll.u32 %v3054_v53, %v219_v44  ;;  %v231_v39 = vshll.u32 %v3055_v55, %v219_v44 }
  0xc1   :  { %v176_v22 = vor.u32 %v175_v32, %v174_v18  ;;  %v179_v49 = vshll.u32 %v178_v52, 23  ;;  %v3317_v51 = vsub.s32 %v473_v2, %v476_v37  ;;  %v232_v56 = vshrl.u32 %v3056_v57, %v220_v30  ;;  %v62_v32 = vpop.permute.xlu0 %61 }
  0xc2   :  { %v230_v54 = vor.u32 %v229_v35, %v228_v45  ;;  %v234_v59 = vshll.u32 %v3056_v57, %v219_v44  ;;  %v235_v60 = vshrl.u32 %v4132_v0, %v220_v30  ;;  %vm237_vm6 = vcmp.lt.s32.totalorder %v3304_v15, 1 }
  0xc3   :  { %v180_v61 = vor.u32 4788187, %v179_v49  ;;  %v479_v41 = vsub.s32 0, %v3317_v51  ;;  %vm238_vm7 = vcmp.lt.s32.totalorder %v3304_v15, 2  ;;  %v393_v34 = vxor.u32 2147483648, %v392_v46 }
  0xc4   :  { %vm103_vm8 = vcmp.lt.s32.totalorder %v3138_v13, 0  ;;  %v221_v36 = vshrl.u32 %v3052_v48, %v220_v30  ;;  %v233_v62 = vor.u32 %v232_v56, %v231_v39  ;;  %v236_v63 = vor.u32 %v235_v60, %v234_v59 }
  0xc5   :  { %vm3330_vm9 = vcmp.le.f32.partialorder %v309_v14, 0.7853982  ;;  %v181_v1 = vand.u32 2147483647, %v180_v61  ;;  %v183_v2 = vcvt.s32.f32 %v176_v22  ;;  %v2591_v44 = vmin.u32 %v479_v41, %v3317_v51 }
  0xc6   :  { %vm240_vm10 = vcmp.lt.s32.totalorder %v3304_v15, 4  ;;  %vm239_vm11 = vcmp.lt.s32.totalorder %v3304_v15, 3  ;;  %v245_v28 = vsel %vm237_vm6, %v224_v40, %v227_v47  ;;  %vm3341_vm12 = vcmp.le.f32.partialorder %v101_v16, 0.7853982 }
  0xc7   :  { %v242_v4 = vsel %vm240_vm10, %v230_v54, 2102212464  ;;  %v246_v6 = vsel %vm240_vm10, %v233_v62, 920167782  ;;  %v184_v30 = vmul.f32 %v183_v2, %v181_v1  ;;  %v481_v8 = vclz %v2591_v44  ;;  %v77_v2 = vpop.permute.xlu1 %76 }
  0xc8   :  { %v241_v10 = vsel %vm237_vm6, %v221_v36, %v224_v40  ;;  %v247_v11 = vsel %vm239_vm11, %v230_v54, %v246_v6  ;;  %v243_v17 = vsel %vm239_vm11, %v227_v47, %v242_v4  ;;  %v249_v16 = vsel %vm237_vm6, %v227_v47, %v230_v54 }
  0xc9   :  { %v248_v19 = vsel %vm238_vm7, %v245_v28, %v247_v11  ;;  %v250_v24 = vsel %vm240_vm10, %v236_v63, 1326507024  ;;  %v394_v18 = vsel %vm311_vm5, %v393_v34, %v392_v46  ;;  %v185_v23 = vxor.u32 2147483648, %v184_v30 }
  0xca   :  { %v2592_v27 = vadd.s32 4294967294, %v481_v8  ;;  %v251_v31 = vsel %vm239_vm11, %v233_v62, %v250_v24  ;;  %v3362_v37 = vmul.u32.u64.low %v3301_v5, %v248_v19  ;;  %v3363_v35 = vmul.u32.u64.high %v3301_v5, %v248_v19, %v3362_v37 }
  0xcb   :  { %v252_v52 = vsel %vm238_vm7, %v249_v16, %v251_v31  ;;  %v624_v40 = vand.u32 2139095040, %v3291_v58  ;;  %v244_v47 = vsel %vm238_vm7, %v241_v10, %v243_v17  ;;  %v628_v39 = vand.u32 8388607, %v621_v7 }
  0xcc   :  { %vm2593_vm13 = vcmp.lt.s32.totalorder %v2592_v27, 0  ;;  %v3369_v46 = vmul.u32.u64.low %v3301_v5, %v252_v52  ;;  %v3370_v45 = vmul.u32.u64.high %v3301_v5, %v252_v52, %v3369_v46  ;;  %v3375_v54 = vmul.f32 %v3132_v9, %v62_v32 }
  0xcd   :  { %v484_v22 = vsel %vm2593_vm13, 0, %v2592_v27  ;;  %v625_v49 = vshrl.u32 %v624_v40, 23  ;;  %v186_v56 = vsel %vm103_vm8, %v185_v23, %v184_v30  ;;  %v469_v59 = vadd.s32 %v3277_v33, %v3284_v42 }
  0xce   :  { %v485_v15 = vsub.s32 32, %v484_v22  ;;  %v489_v60 = vsub.s32 4294967266, %v484_v22  ;;  %v397_v61 = vsel %vm3330_vm9, %v3135_v12, %v394_v18  ;;  %v260_v41 = vmul.u32 %v3301_v5, %v244_v47 }
  0xcf   :  { %v263_v34 = vadd.s32 1, %v3363_v35  ;;  %v2598_v36 = vadd.s32 4294967169, %v625_v49  ;;  %v486_v62 = vshll.u32 %v3317_v51, %v484_v22  ;;  %vm262_vm14 = vc.u32 %v3370_v45, %v3362_v37 }
  0xd0   :  { %v487_v63 = vshrl.u32 %v469_v59, %v485_v15  ;;  %v490_v1 = vadd.s32 127, %v489_v60  ;;  %v189_v33 = vsel %vm3341_vm12, %v3138_v13, %v186_v56  ;;  %v629_v44 = vor.u32 8388608, %v628_v39 }
  0xd1   :  { %v264_v42 = vsel %vm262_vm14, %v263_v34, %v3363_v35  ;;  %v631_v4 = vadd.s32 1, %v2598_v36  ;;  %3019 = vcosq.f32 %v397_v61  ;;  %v3393_v51 = vmul.f32 %v3132_v9, %v77_v2 }
  0xd2   :  { %v488_v5 = vor.u32 %v487_v63, %v486_v62  ;;  %v491_v28 = vshll.u32 %v490_v1, 23  ;;  %v265_v6 = vadd.s32 %v264_v42, %v260_v41  ;;  %3021 = vsinq.f32 %v397_v61 }
  0xd3   :  { %vm632_vm15 = vcmp.gt.s32.totalorder %v631_v4, 0  ;;  %3023 = vcosq.f32 %v189_v33  ;;  %vm415_vm0 = vcmp.lt.s32.totalorder %v3147_v21, 0  ;;  %v3397_v11 = vadd.s32 %v3362_v37, %v3370_v45 }
  0xd4   :  { %v492_v30 = vor.u32 4788187, %v491_v28  ;;  %v266_v8 = vadd.s32 536870912, %v265_v6  ;;  %v633_v10 = vsel %vm632_vm15, %v631_v4, 0  ;;  %3025 = vsinq.f32 %v189_v33 }
  0xd5   :  { %v635_v17 = vand.u32 31, %v633_v10  ;;  %v3399_v19 = vshll.u32 %v629_v44, 8  ;;  %v495_v24 = vcvt.s32.f32 %v488_v5  ;;  %v517_v23 = vand.u32 2147483647, %v3375_v54 }
  0xd6   :  { %v493_v16 = vand.u32 2147483647, %v492_v30  ;;  %v3401_v18 = vshrl.u32 %v266_v8, 30  ;;  %v634_v27 = vshrl.u32 %v633_v10, 5  ;;  %v520_v52 = vand.u32 2139095040, %v3375_v54 }
  0xd7   :  { %v636_v31 = vsub.s32 32, %v635_v17  ;;  %v638_v32 = vshll.u32 %v3052_v48, %v635_v17  ;;  %vm3408_vm1 = vcmp.le.f32.partialorder %v413_v26, 0.7853982  ;;  %v641_v47 = vshll.u32 %v3053_v50, %v635_v17 }
  0xd8   :  { %v496_v35 = vmul.f32 %v495_v24, %v493_v16  ;;  %v268_v40 = vshll.u32 %v3401_v18, 30  ;;  %v644_v46 = vshll.u32 %v3054_v53, %v635_v17  ;;  %v647_v39 = vshll.u32 %v3055_v55, %v635_v17 }
  0xd9   :  { %v639_v45 = vshrl.u32 %v3053_v50, %v636_v31  ;;  %v642_v22 = vshrl.u32 %v3054_v53, %v636_v31  ;;  %v645_v49 = vshrl.u32 %v3055_v55, %v636_v31  ;;  %v648_v59 = vshrl.u32 %v3056_v57, %v636_v31 }
  0xda   :  { %v497_v56 = vxor.u32 2147483648, %v496_v35  ;;  %v3419_v26 = vsub.s32 %v265_v6, %v268_v40  ;;  %v651_v15 = vshrl.u32 %v4132_v0, %v636_v31  ;;  %v650_v34 = vshll.u32 %v3056_v57, %v635_v17 }
  0xdb   :  { %v640_v60 = vor.u32 %v639_v45, %v638_v32  ;;  %v643_v61 = vor.u32 %v642_v22, %v641_v47  ;;  %v646_v41 = vor.u32 %v645_v49, %v644_v46  ;;  %v3424_v36 = vpop.eup %3019  ;;  %v649_v63 = vor.u32 %v648_v59, %v647_v39  ;;  %v2981_v39 = vld [vmem:[%s4123_s3] sm:$0xff]  }
  0xdc   :  { %v271_v62 = vsub.s32 0, %v3419_v26  ;;  %v521_v1 = vshrl.u32 %v520_v52, 23  ;;  %v524_v2 = vand.u32 8388607, %v517_v23  ;;  %v3429_v33 = vpop.eup %3021  ;;  %v637_v42 = vshrl.u32 %v3052_v48, %v636_v31  ;;  %2782 = vmatprep.subr.bf16.mxu0 %v2981_v39 }
  0xdd   :  { %v652_v44 = vor.u32 %v651_v15, %v650_v34  ;;  %vm653_vm2 = vcmp.lt.s32.totalorder %v634_v27, 1  ;;  %vm656_vm3 = vcmp.lt.s32.totalorder %v634_v27, 4  ;;  %v3432_v4 = vpop.eup %3023  ;;  %v498_v5 = vsel %vm415_vm0, %v497_v56, %v496_v35  ;;  %2783 = vmatpush3.bf16.msra.mxu0 %v2981_v39 }
  0xde   :  { %v2583_v28 = vmin.u32 %v271_v62, %v3419_v26  ;;  %vm654_vm4 = vcmp.lt.s32.totalorder %v634_v27, 2  ;;  %v658_v6 = vsel %vm656_vm3, %v646_v41, 2102212464  ;;  %v3438_v30 = vpop.eup %3025  ;;  %vm655_vm6 = vcmp.lt.s32.totalorder %v634_v27, 3  ;;  %v2982_v62 = vld [vmem:[%s4123_s3 + $0x8] sm:$0xff]  }
  0xdf   :  { %v657_v8 = vsel %vm653_vm2, %v637_v42, %v640_v60  ;;  %v661_v10 = vsel %vm653_vm2, %v640_v60, %v643_v61  ;;  %v662_v17 = vsel %vm656_vm3, %v649_v63, 920167782  ;;  %v659_v24 = vsel %vm655_vm6, %v643_v61, %v658_v6  ;;  %2784 = vmatprep.subr.bf16.mxu0 %v2982_v62 }
  0xe0   :  { %v273_v16 = vclz %v2583_v28  ;;  %v663_v31 = vsel %vm655_vm6, %v646_v41, %v662_v17  ;;  %v665_v32 = vsel %vm653_vm2, %v643_v61, %v646_v41  ;;  %v501_v52 = vsel %vm3408_vm1, %v3147_v21, %v498_v5  ;;  %v2983_v5 = vld [vmem:[%s4123_s3 + $0x10] sm:$0xff]  }
  0xe1   :  { %v664_v35 = vsel %vm654_vm4, %v661_v10, %v663_v31  ;;  %v666_v40 = vsel %vm656_vm3, %v652_v44, 1326507024  ;;  %v2594_v47 = vadd.s32 4294967169, %v521_v1  ;;  %v660_v56 = vsel %vm654_vm4, %v657_v8, %v659_v24  ;;  %v72_v44 = vpop.permute.xlu0 %71  ;;  %2785 = vmatpush3.bf16.msra.mxu0 %v2982_v62 }
  0xe2   :  { %v2584_v46 = vadd.s32 4294967294, %v273_v16  ;;  %v667_v45 = vsel %vm655_vm6, %v649_v63, %v666_v40  ;;  %v3447_v22 = vmul.u32.u64.low %v3399_v19, %v664_v35  ;;  %v3448_v49 = vmul.u32.u64.high %v3399_v19, %v664_v35, %v3447_v22  ;;  %2786 = vmatprep.subr.bf16.mxu0 %v2983_v5 }
  0xe3   :  { %v668_v59 = vsel %vm654_vm4, %v665_v32, %v667_v45  ;;  %v525_v15 = vor.u32 8388608, %v524_v2  ;;  %v527_v60 = vadd.s32 1, %v2594_v47  ;;  %v832_v34 = vand.u32 2139095040, %v3393_v51 }
  0xe4   :  { %vm2585_vm7 = vcmp.lt.s32.totalorder %v2584_v46, 0  ;;  %v3457_v61 = vmul.u32.u64.low %v3399_v19, %v668_v59  ;;  %v3458_v41 = vmul.u32.u64.high %v3399_v19, %v668_v59, %v3457_v61  ;;  %3027 = vcosq.f32 %v501_v52 }
  0xe5   :  { %v276_v63 = vsel %vm2585_vm7, 0, %v2584_v46  ;;  %vm528_vm10 = vcmp.gt.s32.totalorder %v527_v60, 0  ;;  %v4131_v27 = vand.u32 2147483647, %v3393_v51  ;;  %3029 = vsinq.f32 %v501_v52  ;;  %2787 = vmatpush3.bf16.msra.mxu0 %v2983_v5 }
  0xe6   :  { %v277_v1 = vsub.s32 32, %v276_v63  ;;  %v281_v2 = vsub.s32 4294967266, %v276_v63  ;;  %v679_v42 = vadd.s32 1, %v3448_v49  ;;  %v676_v28 = vmul.u32 %v3399_v19, %v660_v56 }
  0xe7   :  { %v529_v6 = vsel %vm528_vm10, %v527_v60, 0  ;;  %v3470_v8 = vshll.u32 %v525_v15, 8  ;;  %v833_v10 = vshrl.u32 %v832_v34, 23  ;;  %v278_v17 = vshll.u32 %v3419_v26, %v276_v63  ;;  %v2984_v26 = vld [vmem:[%s4123_s3 + $0x18] sm:$0xff]  }
  0xe8   :  { %v279_v16 = vshrl.u32 %v3397_v11, %v277_v1  ;;  %v282_v24 = vadd.s32 127, %v281_v2  ;;  %vm678_vm11 = vc.u32 %v3458_v41, %v3447_v22  ;;  %v531_v32 = vand.u32 31, %v529_v6  ;;  %2788 = vmatprep.subr.bf16.mxu0 %v2984_v26 }
  0xe9   :  { %v680_v31 = vsel %vm678_vm11, %v679_v42, %v3448_v49  ;;  %v3479_v52 = vand.u32 8388607, %v4131_v27  ;;  %v3482_v19 = vmul.f32 %v3132_v9, %v72_v44  ;;  %v530_v47 = vshrl.u32 %v529_v6, 5  ;;  %2789 = vmatpush3.bf16.msra.mxu0 %v2984_v26 }
  0xea   :  { %v280_v11 = vor.u32 %v279_v16, %v278_v17  ;;  %v283_v35 = vshll.u32 %v282_v24, 23  ;;  %v681_v40 = vadd.s32 %v680_v31, %v676_v28  ;;  %vm207_vm13 = vcmp.lt.s32.totalorder %v3154_v29, 0 }
  0xeb   :  { %v532_v46 = vsub.s32 32, %v531_v32  ;;  %v534_v45 = vshll.u32 %v3052_v48, %v531_v32  ;;  %v537_v49 = vshll.u32 %v3053_v50, %v531_v32  ;;  %v2606_v39 = vadd.s32 4294967169, %v833_v10 }
  0xec   :  { %v284_v9 = vor.u32 4788187, %v283_v35  ;;  %v287_v56 = vcvt.s32.f32 %v280_v11  ;;  %v682_v59 = vadd.s32 536870912, %v681_v40  ;;  %v540_v15 = vshll.u32 %v3054_v53, %v531_v32 }
  0xed   :  { %v535_v60 = vshrl.u32 %v3053_v50, %v532_v46  ;;  %v538_v61 = vshrl.u32 %v3054_v53, %v532_v46  ;;  %v541_v34 = vshrl.u32 %v3055_v55, %v532_v46  ;;  %v543_v62 = vshll.u32 %v3055_v55, %v531_v32 }
  0xee   :  { %vm3497_vm14 = vcmp.le.f32.partialorder %v205_v38, 0.7853982  ;;  %v285_v1 = vand.u32 2147483647, %v284_v9  ;;  %v3501_v2 = vshrl.u32 %v682_v59, 30  ;;  %v544_v42 = vshrl.u32 %v3056_v57, %v532_v46  ;;  %v3505_v28 = vpop.eup %3027 }
  0xef   :  { %v546_v44 = vshll.u32 %v3056_v57, %v531_v32  ;;  %v536_v6 = vor.u32 %v535_v60, %v534_v45  ;;  %v539_v10 = vor.u32 %v538_v61, %v537_v49  ;;  %v542_v17 = vor.u32 %v541_v34, %v540_v15  ;;  %v3508_v16 = vpop.eup %3029 }
  0xf0   :  { %v547_v5 = vshrl.u32 %v4132_v0, %v532_v46  ;;  %v288_v38 = vmul.f32 %v287_v56, %v285_v1  ;;  %v684_v24 = vshll.u32 %v3501_v2, 30  ;;  %v533_v31 = vshrl.u32 %v3052_v48, %v532_v46 }
  0xf1   :  { %v545_v11 = vor.u32 %v544_v42, %v543_v62  ;;  %vm549_vm15 = vcmp.lt.s32.totalorder %v530_v47, 1  ;;  %vm550_vm2 = vcmp.lt.s32.totalorder %v530_v47, 2  ;;  %vm552_vm3 = vcmp.lt.s32.totalorder %v530_v47, 4 }
  0xf2   :  { %v548_v35 = vor.u32 %v547_v5, %v546_v44  ;;  %v289_v32 = vxor.u32 2147483648, %v288_v38  ;;  %v3512_v9 = vsub.s32 %v681_v40, %v684_v24  ;;  %vm551_vm4 = vcmp.lt.s32.totalorder %v530_v47, 3 }
  0xf3   :  { %v554_v45 = vsel %vm552_vm3, %v542_v17, 2102212464  ;;  %v553_v49 = vsel %vm549_vm15, %v533_v31, %v536_v6  ;;  %v557_v15 = vsel %vm549_vm15, %v536_v6, %v539_v10  ;;  %v558_v56 = vsel %vm552_vm3, %v545_v11, 920167782 }
  0xf4   :  { %v555_v59 = vsel %vm551_vm4, %v539_v10, %v554_v45  ;;  %v290_v60 = vsel %vm207_vm13, %v289_v32, %v288_v38  ;;  %v687_v46 = vsub.s32 0, %v3512_v9  ;;  %v559_v61 = vsel %vm551_vm4, %v542_v17, %v558_v56 }
  0xf5   :  { %v561_v34 = vsel %vm549_vm15, %v539_v10, %v542_v17  ;;  %v560_v26 = vsel %vm550_vm2, %v557_v15, %v559_v61  ;;  %v562_v62 = vsel %vm552_vm3, %v548_v35, 1326507024  ;;  %v837_v40 = vor.u32 8388608, %v3479_v52 }
  0xf6   :  { %v4130_v1 = vand.u32 2147483647, %v3482_v19  ;;  %v2599_v42 = vmin.u32 %v687_v46, %v3512_v9  ;;  %v556_v44 = vsel %vm550_vm2, %v553_v49, %v555_v59  ;;  %v563_v6 = vsel %vm551_vm4, %v545_v11, %v562_v62 }
  0xf7   :  { %v839_v5 = vadd.s32 1, %v2606_v39  ;;  %v293_v38 = vsel %vm3497_vm14, %v3154_v29, %v290_v60  ;;  %v564_v10 = vsel %vm550_vm2, %v561_v34, %v563_v6  ;;  %v677_v39 = vadd.s32 %v3447_v22, %v3458_v41 }
  0xf8   :  { %v3530_v17 = vmul.u32.u64.low %v3470_v8, %v560_v26  ;;  %v3531_v24 = vmul.u32.u64.high %v3470_v8, %v560_v26, %v3530_v17  ;;  %v689_v52 = vclz %v2599_v42  ;;  %v3540_v32 = vshll.u32 %v837_v40, 8 }
  0xf9   :  { %v3535_v31 = vmul.u32.u64.low %v3470_v8, %v564_v10  ;;  %v3536_v35 = vmul.u32.u64.high %v3470_v8, %v564_v10, %v3535_v31  ;;  %vm840_vm6 = vcmp.gt.s32.totalorder %v839_v5, 0  ;;  %v728_v47 = vand.u32 2139095040, %v3482_v19 }
  0xfa   :  { %v841_v11 = vsel %vm840_vm6, %v839_v5, 0  ;;  %3031 = vcosq.f32 %v293_v38  ;;  %v2600_v45 = vadd.s32 4294967294, %v689_v52  ;;  %v572_v49 = vmul.u32 %v3470_v8, %v556_v44 }
  0xfb   :  { %v843_v59 = vand.u32 31, %v841_v11  ;;  %3033 = vsinq.f32 %v293_v38  ;;  %v575_v15 = vadd.s32 1, %v3531_v24  ;;  %v3545_v56 = vshrl.u32 %v841_v11, 5 }
  0xfc   :  { %v3549_v60 = vand.u32 8388607, %v4130_v1  ;;  %vm2601_vm7 = vcmp.lt.s32.totalorder %v2600_v45, 0  ;;  %vm574_vm10 = vc.u32 %v3536_v35, %v3530_v17  ;;  %v729_v41 = vshrl.u32 %v728_v47, 23 }
  0xfd   :  { %v844_v22 = vsub.s32 32, %v843_v59  ;;  %v692_v46 = vsel %vm2601_vm7, 0, %v2600_v45  ;;  %v576_v61 = vsel %vm574_vm10, %v575_v15, %v3531_v24  ;;  %v846_v8 = vshll.u32 %v3052_v48, %v843_v59 }
  0xfe   :  { %v395_v34 = vsub.s32 4, %v3235_v25  ;;  %v693_v26 = vsub.s32 32, %v692_v46  ;;  %v697_v62 = vsub.s32 4294967266, %v692_v46  ;;  %v577_v40 = vadd.s32 %v576_v61, %v572_v49 }
  0xff   :  { %v849_v42 = vshll.u32 %v3053_v50, %v843_v59  ;;  %v694_v44 = vshll.u32 %v3512_v9, %v692_v46  ;;  %v847_v6 = vshrl.u32 %v3053_v50, %v844_v22  ;;  %v850_v5 = vshrl.u32 %v3054_v53, %v844_v22 }
 0x100   :  { %v852_v38 = vshll.u32 %v3054_v53, %v843_v59  ;;  %v695_v10 = vshrl.u32 %v677_v39, %v693_v26  ;;  %v698_v52 = vadd.s32 127, %v697_v62  ;;  %v578_v24 = vadd.s32 536870912, %v577_v40 }
 0x101   :  { %v853_v31 = vshrl.u32 %v3055_v55, %v844_v22  ;;  %v848_v11 = vor.u32 %v847_v6, %v846_v8  ;;  %v851_v47 = vor.u32 %v850_v5, %v849_v42  ;;  %v855_v45 = vshll.u32 %v3055_v55, %v843_v59 }
 0x102   :  { %v856_v49 = vshrl.u32 %v3056_v57, %v844_v22  ;;  %v696_v15 = vor.u32 %v695_v10, %v694_v44  ;;  %v699_v61 = vshll.u32 %v698_v52, 23  ;;  %v3564_v9 = vshrl.u32 %v578_v24, 30 }
 0x103   :  { %v854_v46 = vor.u32 %v853_v31, %v852_v38  ;;  %vm623_vm11 = vcmp.lt.s32.totalorder %v3291_v58, 0  ;;  %v845_v1 = vshrl.u32 %v3052_v48, %v844_v22  ;;  %v858_v26 = vshll.u32 %v3056_v57, %v843_v59 }
 0x104   :  { %v857_v39 = vor.u32 %v856_v49, %v855_v45  ;;  %v859_v62 = vshrl.u32 %v4132_v0, %v844_v22  ;;  %v3570_v8 = vpop.eup %3031  ;;  %vm3574_vm15 = vcmp.le.f32.partialorder %v621_v7, 0.7853982  ;;  %v700_v44 = vor.u32 4788187, %v699_v61 }
 0x105   :  { %v703_v6 = vcvt.s32.f32 %v696_v15  ;;  %v580_v5 = vshll.u32 %v3564_v9, 30  ;;  %vm861_vm2 = vcmp.lt.s32.totalorder %v3545_v56, 1  ;;  %v3580_v38 = vpop.eup %3033  ;;  %vm863_vm3 = vcmp.lt.s32.totalorder %v3545_v56, 3 }
 0x106   :  { %v860_v10 = vor.u32 %v859_v62, %v858_v26  ;;  %vm864_vm4 = vcmp.lt.s32.totalorder %v3545_v56, 4  ;;  %v865_v59 = vsel %vm861_vm2, %v845_v1, %v848_v11  ;;  %v701_v22 = vand.u32 2147483647, %v700_v44 }
 0x107   :  { %v3584_v52 = vsub.s32 %v577_v40, %v580_v5  ;;  %v866_v7 = vsel %vm864_vm4, %v854_v46, 2102212464  ;;  %v869_v24 = vsel %vm861_vm2, %v848_v11, %v851_v47  ;;  %v870_v45 = vsel %vm864_vm4, %v857_v39, 920167782 }
 0x108   :  { %v867_v31 = vsel %vm863_vm3, %v851_v47, %v866_v7  ;;  %v873_v49 = vsel %vm861_vm2, %v851_v47, %v854_v46  ;;  %v874_v15 = vsel %vm864_vm4, %v860_v10, 1326507024  ;;  %v704_v61 = vmul.f32 %v703_v6, %v701_v22 }
 0x109   :  { %v583_v27 = vsub.s32 0, %v3584_v52  ;;  %vm862_vm6 = vcmp.lt.s32.totalorder %v3545_v56, 2  ;;  %v871_v26 = vsel %vm863_vm3, %v854_v46, %v870_v45  ;;  %v875_v40 = vsel %vm863_vm3, %v857_v39, %v874_v15 }
 0x10a   :  { %v868_v1 = vsel %vm862_vm6, %v865_v59, %v867_v31  ;;  %v872_v62 = vsel %vm862_vm6, %v869_v24, %v871_v26  ;;  %v2602_v11 = vadd.s32 4294967169, %v729_v41  ;;  %v705_v44 = vxor.u32 2147483648, %v704_v61 }
 0x10b   :  { %v2595_v5 = vmin.u32 %v583_v27, %v3584_v52  ;;  %v876_v7 = vsel %vm862_vm6, %v873_v49, %v875_v40  ;;  %v733_v47 = vor.u32 8388608, %v3549_v60  ;;  %v406_v39 = vxor.u32 2147483648, %v3429_v33 }
 0x10c   :  { %v3597_v6 = vmul.u32.u64.low %v3540_v32, %v876_v7  ;;  %v3598_v10 = vmul.u32.u64.high %v3540_v32, %v876_v7, %v3597_v6  ;;  %v3601_v22 = vmul.u32.u64.low %v3540_v32, %v872_v62  ;;  %v3602_v0 = vmul.u32.u64.high %v3540_v32, %v872_v62, %v3601_v22 }
 0x10d   :  { %v706_v56 = vsel %vm623_vm11, %v705_v44, %v704_v61  ;;  %v585_v46 = vclz %v2595_v5  ;;  %v735_v41 = vadd.s32 1, %v2602_v11  ;;  %v573_v60 = vadd.s32 %v3530_v17, %v3536_v35 }
 0x10e   :  { %v3611_v27 = vsel %vm3574_vm15, %v3291_v58, %v706_v56  ;;  %v884_v59 = vmul.u32 %v3540_v32, %v868_v1  ;;  %v396_v24 = vsel %vm311_vm5, %v395_v34, %v3235_v25  ;;  %v3621_v45 = vshll.u32 %v733_v47, 8 }
 0x10f   :  { %v2596_v31 = vadd.s32 4294967294, %v585_v46  ;;  %vm736_vm7 = vcmp.gt.s32.totalorder %v735_v41, 0  ;;  %v3625_v49 = vsel %vm3330_vm9, 0, %v396_v24  ;;  %vm886_vm10 = vc.u32 %v3598_v10, %v3601_v22 }
 0x110   :  { %v887_v17 = vadd.s32 1, %v3602_v0  ;;  %v409_v35 = vxor.u32 2147483648, %v3424_v36  ;;  %v499_v32 = vsub.s32 4, %v3306_v20  ;;  %3035 = vcosq.f32 %v3611_v27 }
 0x111   :  { %vm2597_vm5 = vcmp.lt.s32.totalorder %v2596_v31, 0  ;;  %v737_v25 = vsel %vm736_vm7, %v735_v41, 0  ;;  %v402_v34 = vadd.s32 3, %v3625_v49  ;;  %vm519_vm9 = vcmp.lt.s32.totalorder %v3375_v54, 0 }
 0x112   :  { %v588_v15 = vsel %vm2597_vm5, 0, %v2596_v31  ;;  %v888_v43 = vsel %vm886_vm10, %v887_v17, %v3602_v0  ;;  %v738_v61 = vshrl.u32 %v737_v25, 5  ;;  %v739_v26 = vand.u32 31, %v737_v25 }
 0x113   :  { %v589_v1 = vsub.s32 32, %v588_v15  ;;  %v590_v62 = vshll.u32 %v3584_v52, %v588_v15  ;;  %v593_v40 = vsub.s32 4294967266, %v588_v15  ;;  %v889_v11 = vadd.s32 %v888_v43, %v884_v59 }
 0x114   :  { %v740_v44 = vsub.s32 32, %v739_v26  ;;  %v742_v5 = vshll.u32 %v3052_v48, %v739_v26  ;;  %v745_v7 = vshll.u32 %v3053_v50, %v739_v26  ;;  %v748_v47 = vshll.u32 %v3054_v53, %v739_v26 }
 0x115   :  { %v591_v6 = vshrl.u32 %v573_v60, %v589_v1  ;;  %v594_v56 = vadd.s32 127, %v593_v40  ;;  %v890_v46 = vadd.s32 536870912, %v889_v11  ;;  %v751_v41 = vshll.u32 %v3055_v55, %v739_v26 }
 0x116   :  { %v741_v0 = vshrl.u32 %v3052_v48, %v740_v44  ;;  %v743_v24 = vshrl.u32 %v3053_v50, %v740_v44  ;;  %v746_v52 = vshrl.u32 %v3054_v53, %v740_v44  ;;  %v749_v59 = vshrl.u32 %v3055_v55, %v740_v44 }
 0x117   :  { %v592_v31 = vor.u32 %v591_v6, %v590_v62  ;;  %v595_v17 = vshll.u32 %v594_v56, 23  ;;  %v3644_v25 = vshrl.u32 %v890_v46, 30  ;;  %v752_v15 = vshrl.u32 %v3056_v57, %v740_v44 }
 0x118   :  { %v744_v60 = vor.u32 %v743_v24, %v742_v5  ;;  %v747_v43 = vor.u32 %v746_v52, %v745_v7  ;;  %v750_v1 = vor.u32 %v749_v59, %v748_v47  ;;  %v754_v40 = vshll.u32 %v3056_v57, %v739_v26 }
 0x119   :  { %vm3651_vm2 = vcmp.le.f32.partialorder %v517_v23, 0.7853982  ;;  %v596_v50 = vor.u32 4788187, %v595_v17  ;;  %v599_v53 = vcvt.s32.f32 %v592_v31  ;;  %v892_v55 = vshll.u32 %v3644_v25, 30 }
 0x11a   :  { %v753_v62 = vor.u32 %v752_v15, %v751_v41  ;;  %v4146_v6 = vmov 1326507024   ;;  %vm757_vm3 = vcmp.lt.s32.totalorder %v738_v61, 1  ;;  %vm758_vm4 = vcmp.lt.s32.totalorder %v738_v61, 2  ;;  %v3657_v5 = vpop.eup %3035 }
 0x11b   :  { %v755_v56 = vshrl.u32 %v4146_v6, %v740_v44  ;;  %vm759_vm6 = vcmp.lt.s32.totalorder %v738_v61, 3  ;;  %v597_v7 = vand.u32 2147483647, %v596_v50  ;;  %v3659_v57 = vsub.s32 %v889_v11, %v892_v55 }
 0x11c   :  { %vm760_vm7 = vcmp.lt.s32.totalorder %v738_v61, 4  ;;  %v761_v23 = vsel %vm757_vm3, %v741_v0, %v744_v60  ;;  %v765_v46 = vsel %vm757_vm3, %v744_v60, %v747_v43  ;;  %v769_v11 = vsel %vm757_vm3, %v747_v43, %v750_v1 }
 0x11d   :  { %v756_v26 = vor.u32 %v755_v56, %v754_v40  ;;  %v762_v47 = vsel %vm760_vm7, %v750_v1, 2102212464  ;;  %v766_v24 = vsel %vm760_vm7, %v753_v62, 920167782  ;;  %v600_v52 = vmul.f32 %v599_v53, %v597_v7 }
 0x11e   :  { %v895_v41 = vsub.s32 0, %v3659_v57  ;;  %v763_v44 = vsel %vm759_vm6, %v747_v43, %v762_v47  ;;  %v767_v59 = vsel %vm759_vm6, %v750_v1, %v766_v24  ;;  %v500_v0 = vsel %vm415_vm0, %v499_v32, %v3306_v20 }
 0x11f   :  { %v768_v31 = vsel %vm758_vm4, %v765_v46, %v767_v59  ;;  %v770_v17 = vsel %vm760_vm7, %v756_v26, 1326507024  ;;  %v601_v15 = vxor.u32 2147483648, %v600_v52  ;;  %v764_v40 = vsel %vm758_vm4, %v761_v23, %v763_v44 }
 0x120   :  { %v2607_v60 = vmin.u32 %v895_v41, %v3659_v57  ;;  %v771_v50 = vsel %vm759_vm6, %v753_v62, %v770_v17  ;;  %v3676_v55 = vmul.u32.u64.low %v3621_v45, %v768_v31  ;;  %v3677_v6 = vmul.u32.u64.high %v3621_v45, %v768_v31, %v3676_v55 }
 0x121   :  { %v772_v53 = vsel %vm758_vm4, %v769_v11, %v771_v50  ;;  %v403_v56 = vand.u32 3, %v402_v34  ;;  %v602_v43 = vsel %vm519_vm9, %v601_v15, %v600_v52  ;;  %vm401_vm0 = vweird.f32 %v3135_v12 }
 0x122   :  { %v897_v1 = vclz %v2607_v60  ;;  %v3682_v20 = vmul.u32.u64.low %v3621_v45, %v772_v53  ;;  %v3683_v32 = vmul.u32.u64.high %v3621_v45, %v772_v53, %v3682_v20  ;;  %3037 = vsinq.f32 %v3611_v27 }
 0x123   :  { %v605_v61 = vsel %vm3651_vm2, %v3375_v54, %v602_v43  ;;  %vm405_vm10 = vcmp.eq.s32.totalorder %v403_v56, 0  ;;  %vm408_vm5 = vcmp.eq.s32.totalorder %v403_v56, 2  ;;  %v885_v34 = vadd.s32 %v3601_v22, %v3598_v10 }
 0x124   :  { %v2608_v62 = vadd.s32 4294967294, %v897_v1  ;;  %v407_v7 = vsel %vm405_vm10, %v3424_v36, %v406_v39  ;;  %v410_v23 = vsel %vm408_vm5, %v409_v35, %v3429_v33  ;;  %3039 = vcosq.f32 %v605_v61 }
 0x125   :  { %v780_v27 = vmul.u32 %v3621_v45, %v764_v40  ;;  %v783_v26 = vadd.s32 1, %v3677_v6  ;;  %v3702_v47 = vsel %vm3408_vm1, 0, %v500_v0  ;;  %3041 = vsinq.f32 %v605_v61 }
 0x126   :  { %vm2609_vm3 = vcmp.lt.s32.totalorder %v2608_v62, 0  ;;  %vm782_vm4 = vc.u32 %v3683_v32, %v3676_v55  ;;  %vm404_vm6 = vcmp.lt.s32.totalorder %v403_v56, 2  ;;  %v506_v24 = vadd.s32 3, %v3702_v47 }
 0x127   :  { %v900_v10 = vsel %vm2609_vm3, 0, %v2608_v62  ;;  %v784_v22 = vsel %vm782_vm4, %v783_v26, %v3677_v6  ;;  %v411_v46 = vsel %vm404_vm6, %v407_v7, %v410_v23  ;;  %v3708_v45 = vadd.s32 %v3676_v55, %v3683_v32 }
 0x128   :  { %v901_v52 = vsub.s32 32, %v900_v10  ;;  %v905_v41 = vsub.s32 4294967266, %v900_v10  ;;  %v785_v44 = vadd.s32 %v784_v22, %v780_v27  ;;  %v507_v37 = vand.u32 3, %v506_v24 }
 0x129   :  { %v510_v59 = vxor.u32 2147483648, %v3508_v16  ;;  %v513_v31 = vxor.u32 2147483648, %v3505_v28  ;;  %v187_v11 = vsub.s32 4, %v3269_v3  ;;  %v902_v17 = vshll.u32 %v3659_v57, %v900_v10 }
 0x12a   :  { %v903_v0 = vshrl.u32 %v885_v34, %v901_v52  ;;  %v906_v15 = vadd.s32 127, %v905_v41  ;;  %v786_v60 = vadd.s32 536870912, %v785_v44  ;;  %v412_v40 = vsel %vm401_vm0, nan, %v411_v46  ;;  %v2985_v41 = vld [vmem:[%s4123_s3 + $0x20] sm:$0xff]  }
 0x12b   :  { %vm509_vm1 = vcmp.eq.s32.totalorder %v507_v37, 0  ;;  %vm512_vm7 = vcmp.eq.s32.totalorder %v507_v37, 2  ;;  %v188_v50 = vsel %vm103_vm8, %v187_v11, %v3269_v3  ;;  %vm4133_vm10 = vcmp.lt.s32.totalorder %v3393_v51, 0  ;;  %2790 = vmatprep.subr.bf16.mxu0 %v2985_v41 }
 0x12c   :  { %v904_v53 = vor.u32 %v903_v0, %v902_v17  ;;  %v907_v55 = vshll.u32 %v906_v15, 23  ;;  %v3719_v6 = vshrl.u32 %v786_v60, 30  ;;  %v511_v57 = vsel %vm509_vm1, %v3505_v28, %v510_v59  ;;  %v3724_v56 = vpop.eup %3037  ;;  %2791 = vmatpush3.bf16.msra.mxu0 %v2985_v41 }
 0x12d   :  { %vm505_vm5 = vweird.f32 %v3147_v21  ;;  %vm508_vm3 = vcmp.lt.s32.totalorder %v507_v37, 2  ;;  %v514_v43 = vsel %vm512_vm7, %v513_v31, %v3508_v16  ;;  %v3733_v3 = vsel %vm3341_vm12, 0, %v188_v50 }
 0x12e   :  { %v4147_v1 = vand.u32 2147483647, %v3393_v51  ;;  %v908_v32 = vor.u32 4788187, %v907_v55  ;;  %v788_v61 = vshll.u32 %v3719_v6, 30  ;;  %v515_v34 = vsel %vm508_vm3, %v511_v57, %v514_v43  ;;  %v3743_v7 = vpop.eup %3039 }
 0x12f   :  { %v198_v62 = vxor.u32 2147483648, %v3438_v30  ;;  %v516_v23 = vsel %vm505_vm5, nan, %v515_v34  ;;  %v194_v14 = vadd.s32 3, %v3733_v3  ;;  %v201_v27 = vxor.u32 2147483648, %v3432_v4  ;;  %v3750_v10 = vpop.eup %3041 }
 0x130   :  { %vm3737_vm8 = vcmp.le.f32.partialorder %v4147_v1, 0.7853982  ;;  %v291_v26 = vsub.s32 4, %v3401_v18  ;;  %v909_v22 = vand.u32 2147483647, %v908_v32  ;;  %v911_v46 = vcvt.s32.f32 %v904_v53 }
 0x131   :  { %v3752_v24 = vsub.s32 %v785_v44, %v788_v61  ;;  %v2946_v52 = vpack.i.bf16 %v516_v23, %v412_v40  ;;  %vm193_vm12 = vweird.f32 %v3138_v13  ;;  %v195_v37 = vand.u32 3, %v194_v14 }
 0x132   :  { %v292_v11 = vsel %vm207_vm13, %v291_v26, %v3401_v18  ;;  %v302_v17 = vxor.u32 2147483648, %v3580_v38  ;;  %v912_v0 = vmul.f32 %v911_v46, %v909_v22  ;;  %v1232_v60 = vand.u32 3, %v3625_v49 }
 0x133   :  { %v791_v15 = vsub.s32 0, %v3752_v24  ;;  %2947 = vrot.lane.b32.xlu1 %v2946_v52, %s3058_s9  ;;  %v294_v44 = vsel %vm3497_vm14, 0, %v292_v11  ;;  %vm197_vm4 = vcmp.eq.s32.totalorder %v195_v37, 0  ;;  %vm200_vm6 = vcmp.eq.s32.totalorder %v195_v37, 2 }
 0x134   :  { %v298_v40 = vadd.s32 3, %v294_v44  ;;  %v305_v50 = vxor.u32 2147483648, %v3570_v8  ;;  %v913_v18 = vxor.u32 2147483648, %v912_v0  ;;  %v199_v55 = vsel %vm197_vm4, %v3432_v4, %v198_v62 }
 0x135   :  { %v2603_v53 = vmin.u32 %v791_v15, %v3752_v24  ;;  %v202_v63 = vsel %vm200_vm6, %v201_v27, %v3438_v30  ;;  %vm196_vm13 = vcmp.lt.s32.totalorder %v195_v37, 2  ;;  %vm297_vm14 = vweird.f32 %v3154_v29 }
 0x136   :  { %v299_v49 = vand.u32 3, %v298_v40  ;;  %v1335_v57 = vand.u32 3, %v3702_v47  ;;  %v914_v43 = vsel %vm4133_vm10, %v913_v18, %v912_v0  ;;  %v203_v32 = vsel %vm196_vm13, %v199_v55, %v202_v63 }
 0x137   :  { %v793_v1 = vclz %v2603_v53  ;;  %vm1234_vm1 = vcmp.eq.s32.totalorder %v1232_v60, 0  ;;  %v917_v61 = vsel %vm3737_vm8, %v3393_v51, %v914_v43  ;;  %v204_v26 = vsel %vm193_vm12, nan, %v203_v32 }
 0x138   :  { %vm301_vm7 = vcmp.eq.s32.totalorder %v299_v49, 0  ;;  %vm304_vm3 = vcmp.eq.s32.totalorder %v299_v49, 2  ;;  %v1236_v34 = vsel %vm1234_vm1, %v3424_v36, %v406_v39  ;;  %vm300_vm4 = vcmp.lt.s32.totalorder %v299_v49, 2 }
 0x139   :  { %v2604_v23 = vadd.s32 4294967294, %v793_v1  ;;  %v303_v47 = vsel %vm301_vm7, %v3570_v8, %v302_v17  ;;  %v306_v14 = vsel %vm304_vm3, %v305_v50, %v3580_v38  ;;  %vm1233_vm6 = vcmp.lt.s32.totalorder %v1232_v60, 2 }
 0x13a   :  { %v307_v22 = vsel %vm300_vm4, %v303_v47, %v306_v14  ;;  %vm1237_vm13 = vcmp.eq.s32.totalorder %v1232_v60, 2  ;;  %3043 = vcosq.f32 %v917_v61  ;;  %vm1337_vm1 = vcmp.eq.s32.totalorder %v1335_v57, 0  ;;  %v2986_v60 = vld [vmem:[%s4123_s3 + $0x28] sm:$0xff]   ;;  %s3059_s3 = smov 64  }
 0x13b   :  { %vm2605_vm10 = vcmp.lt.s32.totalorder %v2604_v23, 0  ;;  %v308_v39 = vsel %vm297_vm14, nan, %v307_v22  ;;  %v1239_v46 = vsel %vm1237_vm13, %v409_v35, %v3429_v33  ;;  %vm1336_vm7 = vcmp.lt.s32.totalorder %v1335_v57, 2  ;;  %2792 = vmatprep.subr.bf16.mxu0 %v2986_v60 }
 0x13c   :  { %v796_v52 = vsel %vm2605_vm10, 0, %v2604_v23  ;;  %v2941_v41 = vpack.i.bf16 %v308_v39, %v204_v26  ;;  %v1240_v37 = vsel %vm1233_vm6, %v1236_v34, %v1239_v46  ;;  %v1339_v15 = vsel %vm1337_vm1, %v3505_v28, %v510_v59  ;;  %2793 = vmatpush3.bf16.msra.mxu0 %v2986_v60 }
 0x13d   :  { %v797_v11 = vsub.s32 32, %v796_v52  ;;  %v801_v0 = vsub.s32 4294967266, %v796_v52  ;;  %v798_v40 = vshll.u32 %v3752_v24, %v796_v52  ;;  %vm1340_vm3 = vcmp.eq.s32.totalorder %v1335_v57, 2 }
 0x13e   :  { %2942 = vrot.lane.b32.xlu0 %v2941_v41, %s3058_s9  ;;  %v1026_v36 = vand.u32 3, %v3733_v3  ;;  %v1129_v33 = vand.u32 3, %v294_v44  ;;  %v1241_v53 = vsel %vm401_vm0, nan, %v1240_v37  ;;  %v1342_v59 = vsel %vm1340_vm3, %v513_v31, %v3508_v16 }
 0x13f   :  { %v799_v35 = vshrl.u32 %v3708_v45, %v797_v11  ;;  %v802_v18 = vadd.s32 127, %v801_v0  ;;  %v1343_v55 = vsel %vm1336_vm7, %v1339_v15, %v1342_v59  ;;  %v603_v24 = vsub.s32 4, %v3564_v9 }
 0x140   :  { %vm1028_vm10 = vcmp.eq.s32.totalorder %v1026_v36, 0  ;;  %vm1031_vm4 = vcmp.eq.s32.totalorder %v1026_v36, 2  ;;  %v1344_v45 = vsel %vm505_vm5, nan, %v1343_v55  ;;  %vm727_vm0 = vcmp.lt.s32.totalorder %v3482_v19, 0 }
 0x141   :  { %v800_v63 = vor.u32 %v799_v35, %v798_v40  ;;  %v803_v3 = vshll.u32 %v802_v18, 23  ;;  %v1030_v12 = vsel %vm1028_vm10, %v3432_v4, %v198_v62  ;;  %v2956_v28 = vpack.i.bf16 %v1344_v45, %v1241_v53 }
 0x142   :  { %vm1027_vm6 = vcmp.lt.s32.totalorder %v1026_v36, 2  ;;  %v1033_v16 = vsel %vm1031_vm4, %v201_v27, %v3438_v30  ;;  %vm1131_vm13 = vcmp.eq.s32.totalorder %v1129_v33, 0  ;;  %3045 = vsinq.f32 %v917_v61 }
 0x143   :  { %v4150_v31 = vand.u32 2147483647, %v3482_v19  ;;  %v804_v21 = vor.u32 4788187, %v803_v3  ;;  %v1034_v49 = vsel %vm1027_vm6, %v1030_v12, %v1033_v16  ;;  %v1133_v62 = vsel %vm1131_vm13, %v3570_v8, %v302_v17  ;;  %2957 = vrot.lane.b32.xlu1 %v2956_v28, %s3059_s3 }
 0x144   :  { %v807_v57 = vcvt.s32.f32 %v800_v63  ;;  %vm1130_vm5 = vcmp.lt.s32.totalorder %v1129_v33, 2  ;;  %vm1134_vm7 = vcmp.eq.s32.totalorder %v1129_v33, 2  ;;  %v604_v4 = vsel %vm519_vm9, %v603_v24, %v3564_v9  ;;  %v3837_v30 = vpop.eup %3043 }
 0x145   :  { %vm3825_vm1 = vcmp.le.f32.partialorder %v4150_v31, 0.7853982  ;;  %vm609_vm3 = vweird.f32 %v3375_v54  ;;  %v805_v27 = vand.u32 2147483647, %v804_v21  ;;  %v1035_v43 = vsel %vm193_vm12, nan, %v1034_v49 }
 0x146   :  { %v1136_v17 = vsel %vm1134_vm7, %v305_v50, %v3580_v38  ;;  %v606_v1 = vsel %vm3651_vm2, 0, %v604_v4  ;;  %v614_v34 = vxor.u32 2147483648, %v3750_v10  ;;  %v707_v9 = vsub.s32 4, %v3501_v2 }
 0x147   :  { %v1137_v32 = vsel %vm1130_vm5, %v1133_v62, %v1136_v17  ;;  %v610_v61 = vadd.s32 3, %v606_v1  ;;  %v808_v23 = vmul.f32 %v807_v57, %v805_v27  ;;  %v617_v13 = vxor.u32 2147483648, %v3743_v7 }
 0x148   :  { %v1138_v47 = vsel %vm297_vm14, nan, %v1137_v32  ;;  %v718_v14 = vxor.u32 2147483648, %v3724_v56  ;;  %v708_v38 = vsel %vm623_vm11, %v707_v9, %v3501_v2  ;;  %v811_v48 = vsub.s32 4, %v3719_v6 }
 0x149   :  { %v2951_v26 = vpack.i.bf16 %v1138_v47, %v1035_v43  ;;  %v611_v8 = vand.u32 3, %v610_v61  ;;  %v809_v50 = vxor.u32 2147483648, %v808_v23  ;;  %v710_v22 = vsel %vm3574_vm15, 0, %v708_v38 }
 0x14a   :  { %v721_v39 = vxor.u32 2147483648, %v3657_v5  ;;  %v915_v29 = vsub.s32 4, %v3644_v25  ;;  %v714_v46 = vadd.s32 3, %v710_v22  ;;  %v812_v41 = vsel %vm727_vm0, %v811_v48, %v3719_v6  ;;  %v2987_v48 = vld [vmem:[%s4124_s5] sm:$0xff]  }
 0x14b   :  { %2952 = vrot.lane.b32.xlu0 %v2951_v26, %s3059_s3  ;;  %vm612_vm9 = vcmp.lt.s32.totalorder %v611_v8, 2  ;;  %vm613_vm2 = vcmp.eq.s32.totalorder %v611_v8, 0  ;;  %vm616_vm12 = vcmp.eq.s32.totalorder %v611_v8, 2  ;;  %v810_v52 = vsel %vm727_vm0, %v809_v50, %v808_v23  ;;  %v2988_v50 = vld [vmem:[%s4124_s5 + $0x8] sm:$0xff]   ;;  %2802 = vmatprep.subr.bf16.mxu1 %v2987_v48 }
 0x14c   :  { %v615_v2 = vsel %vm613_vm2, %v3743_v7, %v614_v34  ;;  %v618_v42 = vsel %vm616_vm12, %v617_v13, %v3750_v10  ;;  %v813_v37 = vsel %vm3825_vm1, %v3482_v19, %v810_v52  ;;  %v715_v0 = vand.u32 3, %v714_v46  ;;  %v3877_v60 = vpop.eup %3045  ;;  %2803 = vmatpush3.bf16.msra.mxu1 %v2987_v48  ;;  %v2992_v46 = vld [vmem:[%s4124_s5 + $0x28] sm:$0xff]  }
 0x14d   :  { %v619_v11 = vsel %vm612_vm9, %v615_v2, %v618_v42  ;;  %v814_v15 = vsel %vm3825_vm1, 0, %v812_v41  ;;  %3047 = vcosq.f32 %v813_v37  ;;  %vm4153_vm11 = vcmp.lt.s32.totalorder %v3393_v51, 0  ;;  %2804 = vmatprep.subr.bf16.mxu1 %v2988_v50  ;;  %v2996_v48 = vld [vmem:[%s4124_s5 + $0x48] sm:$0xff]  }
 0x14e   :  { %v620_v40 = vsel %vm609_vm3, nan, %v619_v11  ;;  %v818_v36 = vadd.s32 3, %v814_v15  ;;  %v916_v6 = vsel %vm4153_vm11, %v915_v29, %v3644_v25  ;;  %3049 = vsinq.f32 %v813_v37  ;;  %v2989_v29 = vld [vmem:[%s4124_s5 + $0x10] sm:$0xff]  }
 0x14f   :  { %vm716_vm15 = vcmp.lt.s32.totalorder %v715_v0, 2  ;;  %vm717_vm14 = vcmp.eq.s32.totalorder %v715_v0, 0  ;;  %vm720_vm10 = vcmp.eq.s32.totalorder %v715_v0, 2  ;;  %v918_v53 = vsel %vm3737_vm8, 0, %v916_v6  ;;  %v95_v11 = vld [vmem:[%s4125_s0 + $0x10] sm:$0xff]  ;;  %v96_v0 = vld [vmem:[%s4125_s0 + $0x18] sm:$0xff] }
 0x150   :  { %v719_v33 = vsel %vm717_vm14, %v3657_v5, %v718_v14  ;;  %v722_v35 = vsel %vm720_vm10, %v721_v39, %v3724_v56  ;;  %v819_v18 = vand.u32 3, %v818_v36  ;;  %vm713_vm4 = vweird.f32 %v3291_v58  ;;  %2805 = vmatpush3.bf16.msra.mxu1 %v2988_v50  ;;  %v2997_v50 = vld [vmem:[%s4124_s5 + $0x50] sm:$0xff]  }
 0x151   :  { %v723_v59 = vsel %vm716_vm15, %v719_v33, %v722_v35  ;;  %v922_v25 = vadd.s32 3, %v918_v53  ;;  %vm921_vm0 = vweird.f32 %v3393_v51  ;;  %v926_v24 = vxor.u32 2147483648, %v3877_v60  ;;  %2806 = vmatprep.subr.bf16.mxu1 %v2989_v29  ;;  %v2991_v51 = vld [vmem:[%s4124_s5 + $0x20] sm:$0xff]  }
 0x152   :  { %v724_v55 = vsel %vm713_vm4, nan, %v723_v59  ;;  %v929_v45 = vxor.u32 2147483648, %v3837_v30  ;;  %v1438_v12 = vand.u32 3, %v606_v1  ;;  %vm820_vm6 = vcmp.lt.s32.totalorder %v819_v18, 2  ;;  %v93_v35 = vld [vmem:[%s4125_s0] sm:$0xff] }
 0x153   :  { %v2961_v63 = vpack.i.bf16 %v724_v55, %v620_v40  ;;  %v923_v3 = vand.u32 3, %v922_v25  ;;  %vm821_vm13 = vcmp.eq.s32.totalorder %v819_v18, 0  ;;  %vm824_vm1 = vcmp.eq.s32.totalorder %v819_v18, 2  ;;  %v94_v18 = vld [vmem:[%s4125_s0 + $0x8] sm:$0xff] }
 0x154   :  { %v1541_v20 = vand.u32 3, %v710_v22  ;;  %v1644_v28 = vand.u32 3, %v814_v15  ;;  %vm817_vm8 = vweird.f32 %v3482_v19  ;;  %v1747_v16 = vand.u32 3, %v918_v53  ;;  %v2990_v19 = vld [vmem:[%s4124_s5 + $0x18] sm:$0xff]   ;;  %2807 = vmatpush3.bf16.msra.mxu1 %v2989_v29 }
 0x155   :  { %2962 = vrot.lane.b32.xlu0 %v2961_v63, %s3058_s9  ;;  %vm924_vm5 = vcmp.lt.s32.totalorder %v923_v3, 2  ;;  %vm925_vm7 = vcmp.eq.s32.totalorder %v923_v3, 0  ;;  %vm928_vm9 = vcmp.eq.s32.totalorder %v923_v3, 2  ;;  %vm1440_vm2 = vcmp.eq.s32.totalorder %v1438_v12, 0  ;;  %2808 = vmatprep.subr.bf16.mxu1 %v2990_v19 }
 0x156   :  { %v927_v31 = vsel %vm925_vm7, %v3837_v30, %v926_v24  ;;  %v930_v44 = vsel %vm928_vm9, %v929_v45, %v3877_v60  ;;  %vm1443_vm12 = vcmp.eq.s32.totalorder %v1438_v12, 2  ;;  %vm1439_vm11 = vcmp.lt.s32.totalorder %v1438_v12, 2 }
 0x157   :  { %v931_v21 = vsel %vm924_vm5, %v927_v31, %v930_v44  ;;  %v1442_v49 = vsel %vm1440_vm2, %v3743_v7, %v614_v34  ;;  %v1445_v62 = vsel %vm1443_vm12, %v617_v13, %v3750_v10  ;;  %v3048_v57 = vpop.eup %3047  ;;  %vm1542_vm15 = vcmp.lt.s32.totalorder %v1541_v20, 2 }
 0x158   :  { %v1446_v4 = vsel %vm1439_vm11, %v1442_v49, %v1445_v62  ;;  %vm1543_vm14 = vcmp.eq.s32.totalorder %v1541_v20, 0  ;;  %vm1546_vm10 = vcmp.eq.s32.totalorder %v1541_v20, 2  ;;  %v3050_v27 = vpop.eup %3049  ;;  %v825_v43 = vxor.u32 2147483648, %v3048_v57  ;;  %2809 = vmatpush3.bf16.msra.mxu1 %v2990_v19  ;;  %v98_v49 = vld [vmem:[%s4125_s0 + $0x28] sm:$0xff]  ;;  %v2642_v19 = vld [vmem:[%s4126_s4] ss:$0 sm:$0xff] }
 0x159   :  { %v1447_v17 = vsel %vm609_vm3, nan, %v1446_v4  ;;  %v1545_v1 = vsel %vm1543_vm14, %v3657_v5, %v718_v14  ;;  %v1548_v32 = vsel %vm1546_vm10, %v721_v39, %v3724_v56  ;;  %v822_v7 = vxor.u32 2147483648, %v3050_v27  ;;  %2810 = vmatprep.subr.bf16.mxu1 %v2991_v51 }
 0x15a   :  { %v932_v10 = vsel %vm921_vm0, nan, %v931_v21  ;;  %v1549_v61 = vsel %vm1542_vm15, %v1545_v1, %v1548_v32  ;;  %vm1645_vm5 = vcmp.lt.s32.totalorder %v1644_v28, 2  ;;  %v826_v34 = vsel %vm824_vm1, %v825_v43, %v3050_v27  ;;  %v97_v21 = vld [vmem:[%s4125_s0 + $0x20] sm:$0xff] }
 0x15b   :  { %v1550_v54 = vsel %vm713_vm4, nan, %v1549_v61  ;;  %vm1646_vm3 = vcmp.eq.s32.totalorder %v1644_v28, 0  ;;  %vm1649_vm7 = vcmp.eq.s32.totalorder %v1644_v28, 2  ;;  %v823_v9 = vsel %vm821_vm13, %v3048_v57, %v822_v7 }
 0x15c   :  { %v2971_v23 = vpack.i.bf16 %v1550_v54, %v1447_v17  ;;  %v1648_v47 = vsel %vm1646_vm3, %v3048_v57, %v822_v7  ;;  %v1651_v13 = vsel %vm1649_vm7, %v825_v43, %v3050_v27  ;;  %v827_v5 = vsel %vm820_vm6, %v823_v9, %v826_v34  ;;  %2811 = vmatpush3.bf16.msra.mxu1 %v2991_v51  ;;  %v99_v34 = vld [vmem:[%s4125_s0 + $0x30] sm:$0xff]  ;;  %v100_v54 = vld [vmem:[%s4125_s0 + $0x38] sm:$0xff] }
 0x15d   :  { %v1652_v56 = vsel %vm1645_vm5, %v1648_v47, %v1651_v13  ;;  %vm1749_vm9 = vcmp.eq.s32.totalorder %v1747_v16, 0  ;;  %vm1752_vm2 = vcmp.eq.s32.totalorder %v1747_v16, 2  ;;  %v828_v14 = vsel %vm817_vm8, nan, %v827_v5  ;;  %2812 = vmatprep.subr.bf16.mxu1 %v2992_v46 }
 0x15e   :  { %2972 = vrot.lane.b32.xlu0 %v2971_v23, %s3059_s3  ;;  %vm1748_vm1 = vcmp.lt.s32.totalorder %v1747_v16, 2  ;;  %v1751_v58 = vsel %vm1749_vm9, %v3837_v30, %v926_v24  ;;  %v1754_v26 = vsel %vm1752_vm2, %v929_v45, %v3877_v60  ;;  %v2966_v8 = vpack.i.bf16 %v932_v10, %v828_v14 }
 0x15f   :  { %v1755_v38 = vsel %vm1748_vm1, %v1751_v58, %v1754_v26  ;;  %v1653_v22 = vsel %vm817_vm8, nan, %v1652_v56  ;;  %vm1821_vm4 = vcmask 261120   ;;  %vm1898_vm6 = vcmask 785408   ;;  %v2993_v26 = vld [vmem:[%s4124_s5 + $0x30] sm:$0xff]  }
 0x160   :  { %v1756_v39 = vsel %vm921_vm0, nan, %v1755_v38  ;;  %2967 = vrot.lane.b32.xlu1 %v2966_v8, %s3058_s9  ;;  %2813 = vmatpush3.bf16.msra.mxu1 %v2992_v46  ;;  %vm1830_vm0 = vcmask 523264   ;;  %v2994_v8 = vld [vmem:[%s4124_s5 + $0x38] sm:$0xff]   ;;  %v2995_v38 = vld [vmem:[%s4124_s5 + $0x40] sm:$0xff]  }
 0x161   :  { %v2976_v30 = vpack.i.bf16 %v1756_v39, %v1653_v22  ;;  %2814 = vmatprep.subr.bf16.mxu1 %v2993_v26  ;;  %2826 = vmatprep.subr.bf16.mxu0 %v2995_v38  ;;  %v2998_v22 = vld [vmem:[%s4124_s5 + $0x58] sm:$0xff]   ;;  %v2999_v39 = vld [vmem:[%s4124_s5 + $0x60] sm:$0xff]  }
 0x164   :  { %2977 = vrot.lane.b32.xlu1 %v2976_v30, %s3059_s3  ;;  %2815 = vmatpush3.bf16.msra.mxu1 %v2993_v26  ;;  %v3000_v30 = vld [vmem:[%s4124_s5 + $0x68] sm:$0xff]  }
 0x165   :  { %2816 = vmatprep.subr.bf16.mxu1 %v2994_v8 }
 0x168   :  { %2817 = vmatpush3.bf16.msra.mxu1 %v2994_v8 }
 0x1a5   :  { %v2948_v52 = vpop.permute.xlu1 %2947 }
 0x1a6   :  { %v2950_v41 = vunpack.i.h.bf16 %v2948_v52  ;;  %v2949_v37 = vunpack.i.l.bf16 %v2948_v52 }
 0x1a8   :  { %v1824_v6 = vsel %vm1821_vm4, %v95_v11, %v2949_v37  ;;  %v1825_v33 = vsel %vm1821_vm4, %v96_v0, %v2950_v41 }
 0x1b0   :  { %v2943_v2 = vpop.permute.xlu0 %2942 }
 0x1b1   :  { %v2945_v40 = vunpack.i.h.bf16 %v2943_v2  ;;  %v2944_v36 = vunpack.i.l.bf16 %v2943_v2 }
 0x1b3   :  { %v1822_v63 = vsel %vm1821_vm4, %v93_v35, %v2944_v36  ;;  %v1823_v3 = vsel %vm1821_vm4, %v94_v18, %v2945_v40 }
 0x1b5   :  { %v2958_v42 = vpop.permute.xlu1 %2957 }
 0x1b6   :  { %v2960_v15 = vunpack.i.h.bf16 %v2958_v42  ;;  %v2959_v60 = vunpack.i.l.bf16 %v2958_v42 }
 0x1b8   :  { %v1833_v53 = vsel %vm1830_vm0, %v1824_v6, %v2959_v60  ;;  %v1834_v59 = vsel %vm1830_vm0, %v1825_v33, %v2960_v15 }
 0x1b9   :  { %v1840_v45 = vpack.c.bf16 %v1834_v59, %v1833_v53 }
 0x1bd   :  { %v2953_v25 = vpop.permute.xlu0 %2952 }
 0x1be   :  { %v2955_v55 = vunpack.i.h.bf16 %v2953_v25  ;;  %v2954_v24 = vunpack.i.l.bf16 %v2953_v25  ;;  %v3001_v25 = vld [vmem:[%s4124_s5 + $0x70] sm:$0xff]  }
 0x1c0   :  { %v1831_v12 = vsel %vm1830_vm0, %v1822_v63, %v2954_v24  ;;  %v1832_v20 = vsel %vm1830_vm0, %v1823_v3, %v2955_v55  ;;  %v3002_v55 = vld [vmem:[%s4124_s5 + $0x78] sm:$0xff]   ;;  %v3003_v24 = vld [vmem:[%s4124_s5 + $0x80] sm:$0xff]   ;;  %v3004_v63 = vld [vmem:[%s4124_s5 + $0x88] sm:$0xff]  }
 0x1c1   :  { %v1839_v28 = vpack.c.bf16 %v1832_v20, %v1831_v12  ;;  %2850 = vmatprep.subr.bf16.mxu1 %v3003_v24  ;;  %v3005_v3 = vld [vmem:[%s4124_s5 + $0x90] sm:$0xff]   ;;  %v3007_v12 = vld [vmem:[%s4124_s5 + $0xa0] sm:$0xff]   ;;  %v3008_v20 = vld [vmem:[%s4124_s5 + $0xa8] sm:$0xff]  }
 0x1c3   :  { %2794 = vmatprep.mubr.msk.bf16.mxu0 %vm1898_vm6, %v1839_v28  ;;  %v2654_v28 = vld [vmem:[%s4126_s4 + $0x1] ss:$0 sm:$0xff] }
 0x1c4   :  { %2795 = vmatmul.mubr.msk.bf16.vlgmr.msra.gmra.mrb[0].mxu0 %vm1898_vm6, %v1840_v45  ;;  %v3006_v45 = vld [vmem:[%s4124_s5 + $0x98] sm:$0xff]  }
 0x1c5   :  { %2827 = vmatpush3.bf16.msra.mxu0 %v2995_v38  ;;  %v3009_v38 = vld [vmem:[%s4124_s5 + $0xb0] sm:$0xff]  }
 0x1c6   :  { %2828 = vmatprep.subr.bf16.mxu0 %v2996_v48 }
 0x1c7   :  { %v2963_v16 = vpop.permute.xlu0 %2962 }
 0x1c8   :  { %v2965_v31 = vunpack.i.h.bf16 %v2963_v16  ;;  %v2964_v44 = vunpack.i.l.bf16 %v2963_v16 }
 0x1c9   :  { %2829 = vmatpush3.bf16.msra.mxu0 %v2996_v48  ;;  %v3010_v48 = vld [vmem:[%s4124_s5 + $0xb8] sm:$0xff]  }
 0x1ca   :  { %v1826_v27 = vsel %vm1821_vm4, %v97_v21, %v2964_v44  ;;  %v1827_v43 = vsel %vm1821_vm4, %v98_v49, %v2965_v31  ;;  %2830 = vmatprep.subr.bf16.mxu0 %v2997_v50 }
 0x1cd   :  { %2831 = vmatpush3.bf16.msra.mxu0 %v2997_v50  ;;  %v3011_v50 = vld [vmem:[%s4127_s6] sm:$0xff]  }
 0x1ce   :  { %2832 = vmatprep.subr.bf16.mxu0 %v2998_v22 }
 0x1d0   :  { %v2973_v62 = vpop.permute.xlu0 %2972 }
 0x1d1   :  { %v2975_v57 = vunpack.i.h.bf16 %v2973_v62  ;;  %v2974_v4 = vunpack.i.l.bf16 %v2973_v62  ;;  %2833 = vmatpush3.bf16.msra.mxu0 %v2998_v22  ;;  %v3012_v22 = vld [vmem:[%s4127_s6 + $0x8] sm:$0xff]  }
 0x1d2   :  { %v2968_v17 = vpop.permute.xlu1 %2967  ;;  %2834 = vmatprep.subr.bf16.mxu0 %v2999_v39 }
 0x1d3   :  { %v1835_v1 = vsel %vm1830_vm0, %v1826_v27, %v2974_v4  ;;  %v1836_v32 = vsel %vm1830_vm0, %v1827_v43, %v2975_v57  ;;  %v2970_v10 = vunpack.i.h.bf16 %v2968_v17  ;;  %v2969_v61 = vunpack.i.l.bf16 %v2968_v17 }
 0x1d4   :  { %v1841_v7 = vpack.c.bf16 %v1836_v32, %v1835_v1 }
 0x1d5   :  { %v1828_v13 = vsel %vm1821_vm4, %v99_v34, %v2969_v61  ;;  %v1829_v5 = vsel %vm1821_vm4, %v100_v54, %v2970_v10  ;;  %2835 = vmatpush3.bf16.msra.mxu0 %v2999_v39  ;;  %v3013_v39 = vld [vmem:[%s4127_s6 + $0x10] sm:$0xff]  }
 0x1d6   :  { %2798 = vmatprep.mubr.msk.bf16.mxu0 %vm1898_vm6, %v1841_v7  ;;  %v2978_v9 = vpop.permute.xlu1 %2977  ;;  %2836 = vmatprep.subr.bf16.mxu0 %v3000_v30 }
 0x1d7   :  { %v2980_v23 = vunpack.i.h.bf16 %v2978_v9  ;;  %v2979_v47 = vunpack.i.l.bf16 %v2978_v9 }
 0x1d9   :  { %v1837_v56 = vsel %vm1830_vm0, %v1828_v13, %v2979_v47  ;;  %v1838_v14 = vsel %vm1830_vm0, %v1829_v5, %v2980_v23  ;;  %2837 = vmatpush3.bf16.msra.mxu0 %v3000_v30  ;;  %v3014_v30 = vld [vmem:[%s4127_s6 + $0x18] sm:$0xff]  }
 0x1da   :  { %v1842_v58 = vpack.c.bf16 %v1838_v14, %v1837_v56  ;;  %2838 = vmatprep.subr.bf16.mxu0 %v3001_v25 }
 0x1dc   :  { %2799 = vmatmul.mubr.msk.bf16.gmra.mrb[4].mxu0 %vm1898_vm6, %v1842_v58 }
 0x1dd   :  { %2839 = vmatpush3.bf16.msra.mxu0 %v3001_v25 }
 0x1de   :  { %2840 = vmatprep.subr.bf16.mxu0 %v3002_v55 }
 0x1e1   :  { %2841 = vmatpush3.bf16.msra.mxu0 %v3002_v55 }
 0x1e2   :  { %2874 = vmatprep.subr.bf16.mxu0 %v3011_v50 }
 0x297   :  { %v2796_v29 = vpop.f32.mrb[0].mxu0 }
 0x298   :  { %v1945_v51 = vpop.f32.mrb[1].mxu0  ;;  %v1954_v52 = vadd.f32 %v2796_v29, %v2642_v19  ;;  %v3015_v29 = vld [vmem:[%s4127_s6 + $0x20] sm:$0xff]  }
 0x299   :  { %v2797_v46 = vpop.f32.mrb[2].mxu0  ;;  %v1946_v41 = vadd.f32 %v2642_v19, %v1945_v51  ;;  %v2680_v51 = vld [vmem:[%s4126_s4 + $0x2] ss:$0 sm:$0xff] }
 0x29a   :  { %v1957_v2 = vadd.f32 %v2797_v46, %v2642_v19  ;;  %v1948_v42 = vpop.f32.mrb[3].mxu0 }
 0x29b   :  { %v1949_v37 = vadd.f32 %v2642_v19, %v1948_v42 }
 0x29c   :  { %v1977_v11 = vpack.c.bf16 %v1957_v2, %v1954_v52 }
 0x29d   :  { %v1976_v0 = vpack.c.bf16 %v1949_v37, %v1946_v41 }
 0x29f   :  { %2818 = vmatprep.mubr.bf16.mxu1 %v1976_v0 }
 0x2a0   :  { %2819 = vmatmul.mubr.bf16.vlgmr.msra.gmra.mrb[0].mxu1 %v1977_v11 }
 0x2a1   :  { %2851 = vmatpush3.bf16.msra.mxu1 %v3003_v24 }
 0x2a2   :  { %2852 = vmatprep.subr.bf16.mxu1 %v3004_v63 }
 0x2a5   :  { %2853 = vmatpush3.bf16.msra.mxu1 %v3004_v63 }
 0x2a6   :  { %2854 = vmatprep.subr.bf16.mxu1 %v3005_v3 }
 0x2a9   :  { %2855 = vmatpush3.bf16.msra.mxu1 %v3005_v3 }
 0x2aa   :  { %2856 = vmatprep.subr.bf16.mxu1 %v3006_v45 }
 0x2ad   :  { %2857 = vmatpush3.bf16.msra.mxu1 %v3006_v45 }
 0x2ae   :  { %2858 = vmatprep.subr.bf16.mxu1 %v3007_v12 }
 0x2af   :  { %v2800_v15 = vpop.f32.mrb[4].mxu0 }
 0x2b0   :  { %v1961_v60 = vpop.f32.mrb[5].mxu0  ;;  %v1970_v36 = vadd.f32 %v2800_v15, %v2642_v19 }
 0x2b1   :  { %v2801_v40 = vpop.f32.mrb[6].mxu0  ;;  %v1962_v35 = vadd.f32 %v2642_v19, %v1961_v60  ;;  %2859 = vmatpush3.bf16.msra.mxu1 %v3007_v12 }
 0x2b2   :  { %v1973_v6 = vadd.f32 %v2801_v40, %v2642_v19  ;;  %v1964_v33 = vpop.f32.mrb[7].mxu0  ;;  %2860 = vmatprep.subr.bf16.mxu1 %v3008_v20 }
 0x2b3   :  { %v1965_v18 = vadd.f32 %v2642_v19, %v1964_v33  ;;  %v3016_v19 = vld [vmem:[%s4127_s6 + $0x28] sm:$0xff]  }
 0x2b4   :  { %v1979_v53 = vpack.c.bf16 %v1973_v6, %v1970_v36 }
 0x2b5   :  { %v1978_v59 = vpack.c.bf16 %v1965_v18, %v1962_v35  ;;  %2861 = vmatpush3.bf16.msra.mxu1 %v3008_v20 }
 0x2b6   :  { %2862 = vmatprep.subr.bf16.mxu1 %v3009_v38 }
 0x2b7   :  { %2822 = vmatprep.mubr.bf16.mxu1 %v1978_v59 }
 0x2b8   :  { %2823 = vmatmul.mubr.bf16.gmra.mrb[4].mxu1 %v1979_v53 }
 0x2b9   :  { %2863 = vmatpush3.bf16.msra.mxu1 %v3009_v38 }
 0x2ba   :  { %2864 = vmatprep.subr.bf16.mxu1 %v3010_v48 }
 0x2bd   :  { %2865 = vmatpush3.bf16.msra.mxu1 %v3010_v48 }
 0x373   :  { %v2820_v16 = vpop.f32.mrb[0].mxu1 }
 0x374   :  { %v2095_v31 = vadd.f32 %v2820_v16, %v2654_v28  ;;  %v2086_v44 = vpop.f32.mrb[1].mxu1 }
 0x375   :  { %v2087_v21 = vadd.f32 %v2654_v28, %v2086_v44  ;;  %v2821_v49 = vpop.f32.mrb[2].mxu1  ;;  %v3018_v44 = vld [vmem:[%s4127_s6 + $0x38] sm:$0xff]  }
 0x376   :  { %v2098_v62 = vadd.f32 %v2821_v49, %v2654_v28  ;;  %v2089_v57 = vpop.f32.mrb[3].mxu1  ;;  %v2119_v27 = vmax.f32 %v2095_v31, 0.0  ;;  %v3017_v31 = vld [vmem:[%s4127_s6 + $0x30] sm:$0xff]  }
 0x377   :  { %v2090_v4 = vadd.f32 %v2654_v28, %v2089_v57  ;;  %v2117_v17 = vmax.f32 %v2087_v21, 0.0  ;;  %v2706_v21 = vld [vmem:[%s4126_s4 + $0x3] ss:$0 sm:$0xff] }
 0x378   :  { %v2120_v43 = vmax.f32 %v2098_v62, 0.0 }
 0x379   :  { %v2118_v1 = vmax.f32 %v2090_v4, 0.0 }
 0x37a   :  { %v2126_v32 = vpack.c.bf16 %v2120_v43, %v2119_v27 }
 0x37b   :  { %v2125_v7 = vpack.c.bf16 %v2118_v1, %v2117_v17 }
 0x37d   :  { %2842 = vmatprep.mubr.bf16.mxu0 %v2125_v7 }
 0x37e   :  { %2843 = vmatmul.mubr.bf16.vlgmr.msra.gmra.mrb[8].mxu0 %v2126_v32 }
 0x37f   :  { %2875 = vmatpush3.bf16.msra.mxu0 %v3011_v50 }
 0x380   :  { %2876 = vmatprep.subr.bf16.mxu0 %v3012_v22 }
 0x383   :  { %2877 = vmatpush3.bf16.msra.mxu0 %v3012_v22 }
 0x384   :  { %2878 = vmatprep.subr.bf16.mxu0 %v3013_v39 }
 0x387   :  { %2879 = vmatpush3.bf16.msra.mxu0 %v3013_v39  ;;  %v2715_v39 = vld [vmem:[%s4128_s7] ss:$0 sm:$0xff] }
 0x388   :  { %2880 = vmatprep.subr.bf16.mxu0 %v3014_v30 }
 0x38b   :  { %v2824_v10 = vpop.f32.mrb[4].mxu1  ;;  %2881 = vmatpush3.bf16.msra.mxu0 %v3014_v30 }
 0x38c   :  { %v2111_v61 = vadd.f32 %v2824_v10, %v2654_v28  ;;  %v2102_v34 = vpop.f32.mrb[5].mxu1  ;;  %2882 = vmatprep.subr.bf16.mxu0 %v3015_v29 }
 0x38d   :  { %v2103_v54 = vadd.f32 %v2654_v28, %v2102_v34  ;;  %v2825_v9 = vpop.f32.mrb[6].mxu1 }
 0x38e   :  { %v2114_v23 = vadd.f32 %v2825_v9, %v2654_v28  ;;  %v2105_v47 = vpop.f32.mrb[7].mxu1  ;;  %v2123_v5 = vmax.f32 %v2111_v61, 0.0 }
 0x38f   :  { %v2106_v13 = vadd.f32 %v2654_v28, %v2105_v47  ;;  %v2121_v14 = vmax.f32 %v2103_v54, 0.0  ;;  %2883 = vmatpush3.bf16.msra.mxu0 %v3015_v29 }
 0x390   :  { %v2124_v56 = vmax.f32 %v2114_v23, 0.0  ;;  %2884 = vmatprep.subr.bf16.mxu0 %v3016_v19 }
 0x391   :  { %v2122_v58 = vmax.f32 %v2106_v13, 0.0 }
 0x392   :  { %v2128_v26 = vpack.c.bf16 %v2124_v56, %v2123_v5 }
 0x393   :  { %v2127_v8 = vpack.c.bf16 %v2122_v58, %v2121_v14  ;;  %2885 = vmatpush3.bf16.msra.mxu0 %v3016_v19 }
 0x394   :  { %2886 = vmatprep.subr.bf16.mxu0 %v3017_v31 }
 0x395   :  { %2846 = vmatprep.mubr.bf16.mxu0 %v2127_v8 }
 0x396   :  { %2847 = vmatmul.mubr.bf16.gmra.mrb[12].mxu0 %v2128_v26 }
 0x397   :  { %2887 = vmatpush3.bf16.msra.mxu0 %v3017_v31 }
 0x398   :  { %2888 = vmatprep.subr.bf16.mxu0 %v3018_v44 }
 0x39b   :  { %2889 = vmatpush3.bf16.msra.mxu0 %v3018_v44 }
 0x451   :  { %v2844_v46 = vpop.f32.mrb[8].mxu0 }
 0x452   :  { %v2245_v52 = vadd.f32 %v2844_v46, %v2680_v51  ;;  %v2236_v2 = vpop.f32.mrb[9].mxu0 }
 0x453   :  { %v2237_v42 = vadd.f32 %v2680_v51, %v2236_v2  ;;  %v2845_v41 = vpop.f32.mrb[10].mxu0 }
 0x454   :  { %v2248_v37 = vadd.f32 %v2845_v41, %v2680_v51  ;;  %v2239_v11 = vpop.f32.mrb[11].mxu0  ;;  %v2269_v15 = vmax.f32 %v2245_v52, 0.0 }
 0x455   :  { %v2240_v0 = vadd.f32 %v2680_v51, %v2239_v11  ;;  %v2267_v40 = vmax.f32 %v2237_v42, 0.0 }
 0x456   :  { %v2270_v60 = vmax.f32 %v2248_v37, 0.0 }
 0x457   :  { %v2268_v36 = vmax.f32 %v2240_v0, 0.0 }
 0x458   :  { %v2276_v6 = vpack.c.bf16 %v2270_v60, %v2269_v15 }
 0x459   :  { %v2275_v33 = vpack.c.bf16 %v2268_v36, %v2267_v40 }
 0x45b   :  { %2866 = vmatprep.mubr.bf16.mxu1 %v2275_v33 }
 0x45c   :  { %2867 = vmatmul.mubr.bf16.vlgmr.msra.gmra.mrb[8].mxu1 %v2276_v6 }
 0x469   :  { %v2848_v35 = vpop.f32.mrb[12].mxu0 }
 0x46a   :  { %v2261_v18 = vadd.f32 %v2848_v35, %v2680_v51  ;;  %v2252_v53 = vpop.f32.mrb[13].mxu0 }
 0x46b   :  { %v2253_v59 = vadd.f32 %v2680_v51, %v2252_v53  ;;  %v2849_v25 = vpop.f32.mrb[14].mxu0 }
 0x46c   :  { %v2264_v55 = vadd.f32 %v2849_v25, %v2680_v51  ;;  %v2255_v24 = vpop.f32.mrb[15].mxu0  ;;  %v2273_v3 = vmax.f32 %v2261_v18, 0.0 }
 0x46d   :  { %v2256_v63 = vadd.f32 %v2680_v51, %v2255_v24  ;;  %v2271_v12 = vmax.f32 %v2253_v59, 0.0 }
 0x46e   :  { %v2274_v45 = vmax.f32 %v2264_v55, 0.0 }
 0x46f   :  { %v2272_v20 = vmax.f32 %v2256_v63, 0.0 }
 0x470   :  { %v2278_v28 = vpack.c.bf16 %v2274_v45, %v2273_v3 }
 0x471   :  { %v2277_v16 = vpack.c.bf16 %v2272_v20, %v2271_v12 }
 0x473   :  { %2870 = vmatprep.mubr.bf16.mxu1 %v2277_v16 }
 0x474   :  { %2871 = vmatmul.mubr.bf16.gmra.mrb[12].mxu1 %v2278_v28 }
 0x52f   :  { %v2868_v49 = vpop.f32.mrb[8].mxu1 }
 0x530   :  { %v2395_v62 = vadd.f32 %v2868_v49, %v2706_v21  ;;  %v2386_v57 = vpop.f32.mrb[9].mxu1 }
 0x531   :  { %v2387_v4 = vadd.f32 %v2706_v21, %v2386_v57  ;;  %v2869_v27 = vpop.f32.mrb[10].mxu1 }
 0x532   :  { %v2398_v43 = vadd.f32 %v2869_v27, %v2706_v21  ;;  %v2389_v17 = vpop.f32.mrb[11].mxu1  ;;  %v2419_v32 = vmax.f32 %v2395_v62, 0.0 }
 0x533   :  { %v2390_v1 = vadd.f32 %v2706_v21, %v2389_v17  ;;  %v2417_v10 = vmax.f32 %v2387_v4, 0.0 }
 0x534   :  { %v2420_v7 = vmax.f32 %v2398_v43, 0.0 }
 0x535   :  { %v2418_v61 = vmax.f32 %v2390_v1, 0.0 }
 0x536   :  { %v2426_v34 = vpack.c.bf16 %v2420_v7, %v2419_v32 }
 0x537   :  { %v2425_v54 = vpack.c.bf16 %v2418_v61, %v2417_v10 }
 0x539   :  { %2890 = vmatprep.mubr.bf16.mxu0 %v2425_v54 }
 0x53a   :  { %2891 = vmatmul.mubr.bf16.vlgmr.msra.gmra.mrb[16].mxu0 %v2426_v34 }
 0x547   :  { %v2872_v9 = vpop.f32.mrb[12].mxu1 }
 0x548   :  { %v2411_v23 = vadd.f32 %v2872_v9, %v2706_v21  ;;  %v2402_v47 = vpop.f32.mrb[13].mxu1 }
 0x549   :  { %v2403_v13 = vadd.f32 %v2706_v21, %v2402_v47  ;;  %v2873_v5 = vpop.f32.mrb[14].mxu1 }
 0x54a   :  { %v2414_v56 = vadd.f32 %v2873_v5, %v2706_v21  ;;  %v2405_v14 = vpop.f32.mrb[15].mxu1  ;;  %v2423_v26 = vmax.f32 %v2411_v23, 0.0 }
 0x54b   :  { %v2406_v58 = vadd.f32 %v2706_v21, %v2405_v14  ;;  %v2421_v38 = vmax.f32 %v2403_v13, 0.0 }
 0x54c   :  { %v2424_v8 = vmax.f32 %v2414_v56, 0.0 }
 0x54d   :  { %v2422_v48 = vmax.f32 %v2406_v58, 0.0 }
 0x54e   :  { %v2428_v50 = vpack.c.bf16 %v2424_v8, %v2423_v26 }
 0x54f   :  { %v2427_v22 = vpack.c.bf16 %v2422_v48, %v2421_v38 }
 0x551   :  { %2894 = vmatprep.mubr.bf16.mxu0 %v2427_v22 }
 0x552   :  { %2895 = vmatmul.mubr.bf16.gmra.mrb[20].mxu0 %v2428_v50 }
 0x60d   :  { %v2892_v30 = vpop.f32.mrb[16].mxu0 }
 0x60e   :  { %v2543_v29 = vadd.f32 %v2892_v30, %v2715_v39  ;;  %v2534_v19 = vpop.f32.mrb[17].mxu0 }
 0x60f   :  { %v2535_v51 = vadd.f32 %v2715_v39, %v2534_v19  ;;  %v2893_v46 = vpop.f32.mrb[18].mxu0 }
 0x610   :  { %2567 = vst.msk [vmem:[%s4129_s8 + $0x10] sm:$0xff] %vm1821_vm4, %v2543_v29  ;;  %v2546_v52 = vadd.f32 %v2893_v46, %v2715_v39  ;;  %v2537_v2 = vpop.f32.mrb[19].mxu0 }
 0x611   :  { %2565 = vst.msk [vmem:[%s4129_s8] sm:$0xff] %vm1821_vm4, %v2535_v51  ;;  %v2538_v42 = vadd.f32 %v2715_v39, %v2537_v2 }
 0x612   :  { %2568 = vst.msk [vmem:[%s4129_s8 + $0x18] sm:$0xff] %vm1821_vm4, %v2546_v52 }
 0x613   :  { %2566 = vst.msk [vmem:[%s4129_s8 + $0x8] sm:$0xff] %vm1821_vm4, %v2538_v42 }
 0x625   :  { %v2896_v41 = vpop.f32.mrb[20].mxu0 }
 0x626   :  { %v2559_v37 = vadd.f32 %v2896_v41, %v2715_v39  ;;  %v2550_v11 = vpop.f32.mrb[21].mxu0 }
 0x627   :  { %v2551_v0 = vadd.f32 %v2715_v39, %v2550_v11  ;;  %v2897_v15 = vpop.f32.mrb[22].mxu0 }
 0x628   :  { %2571 = vst.msk [vmem:[%s4129_s8 + $0x30] sm:$0xff] %vm1821_vm4, %v2559_v37  ;;  %v2562_v60 = vadd.f32 %v2897_v15, %v2715_v39  ;;  %v2553_v40 = vpop.f32.mrb[23].mxu0 }
 0x629   :  { %2569 = vst.msk [vmem:[%s4129_s8 + $0x20] sm:$0xff] %vm1821_vm4, %v2551_v0  ;;  %v2554_v36 = vadd.f32 %v2715_v39, %v2553_v40 }
 0x62a   :  { %2572 = vst.msk [vmem:[%s4129_s8 + $0x38] sm:$0xff] %vm1821_vm4, %v2562_v60 }
 0x62b   :  { %2570 = vst.msk [vmem:[%s4129_s8 + $0x28] sm:$0xff] %vm1821_vm4, %v2554_v36 }

</bundles_post_ra>
